<compile_context>
chip_gen: v7x
topology: tpu7x:2x2x1
jax: 0.10.0
libtpu: 0.0.40
codegen_flags: <defaults>
</compile_context>

<pallas_src>
from functools import partial

import jax
import jax.numpy as jnp
from jax.experimental import pallas as pl
from jax.experimental.pallas import tpu as pltpu


def mha_kernel(x_ref, wq_ref, wk_ref, wv_ref, bq_ref, bk_ref, bv_ref, wo_ref, bo_ref,
               o_ref, k_scr, v_scr, m_scr, l_scr, acc_scr,
               *, scale, tq, tkv, num_heads):
    """One (batch row, query tile) grid step.

    Invariant: the query-tile grid axis must stay innermost and sequential
    ("arbitrary") — the K/V projection runs only at qi == 0 and is reused by all
    later query tiles of the same batch row via the VMEM scratch buffers.
    """
    H = num_heads
    C = x_ref.shape[2]
    D = C // H
    qi = pl.program_id(1)

    def split_heads(y2d):
        # (rows, C) -> (H, rows, D): layout plumbing only (static lane slices).
        return jnp.stack([y2d[:, h * D:(h + 1) * D] for h in range(H)], axis=0)

    # ---- K/V projection: once per batch row, wide (T, C) @ (C, C) MXU matmuls ----
    @pl.when(qi == 0)
    def _project_kv():
        x_row = x_ref[0]                                                  # (T, C)
        k2 = jnp.dot(x_row, wk_ref[...], preferred_element_type=jnp.float32) + bk_ref[...]
        v2 = jnp.dot(x_row, wv_ref[...], preferred_element_type=jnp.float32) + bv_ref[...]
        for h in range(H):
            k_scr[h] = k2[:, h * D:(h + 1) * D]
            v_scr[h] = v2[:, h * D:(h + 1) * D]

    # ---- Q projection for this query tile: wide (tq, C) @ (C, C), 1/sqrt(D) folded in ----
    q_start = pl.multiple_of(qi * tq, tq)
    xq = x_ref[0, pl.ds(q_start, tq), :]                                  # (tq, C)
    q2 = jnp.dot(xq, wq_ref[...], preferred_element_type=jnp.float32) + bq_ref[...]
    q = split_heads(q2 * scale)                                           # (H, tq, D)

    # ---- flash-style online softmax over causal KV tiles ----
    m_scr[...] = jnp.full(m_scr.shape, -1e30, dtype=m_scr.dtype)
    l_scr[...] = jnp.zeros(l_scr.shape, dtype=l_scr.dtype)
    acc_scr[...] = jnp.zeros(acc_scr.shape, dtype=acc_scr.dtype)

    n_kv = qi + 1      # tkv == tq: KV blocks strictly above the diagonal are skipped

    @pl.loop(0, n_kv)
    def _kv_step(kv):
        start = pl.multiple_of(kv * tkv, tkv)
        k = k_scr[:, pl.ds(start, tkv), :]                                # (H, tkv, D)
        v = v_scr[:, pl.ds(start, tkv), :]                                # (H, tkv, D)

        s = jax.lax.dot_general(q, k, (((2,), (2,)), ((0,), (0,))),
                                preferred_element_type=jnp.float32)       # (H, tq, tkv)

        # Causal mask from 2-D iotas broadcast over heads (finite sentinel: the
        # diagonal is always unmasked, so no row is ever fully masked).
        row = qi * tq + jax.lax.broadcasted_iota(jnp.int32, (tq, tkv), 0)
        col = kv * tkv + jax.lax.broadcasted_iota(jnp.int32, (tq, tkv), 1)
        s = jnp.where((row >= col)[None], s, -1e30)

        m_prev = m_scr[...]
        m_new = jnp.maximum(m_prev, jnp.max(s, axis=-1, keepdims=True))   # (H, tq, 1)
        alpha = jnp.exp(m_prev - m_new)
        p = jnp.exp(s - m_new)
        l_scr[...] = alpha * l_scr[...] + jnp.sum(p, axis=-1, keepdims=True)
        acc_scr[...] = alpha * acc_scr[...] + jax.lax.dot_general(
            p, v, (((2,), (1,)), ((0,), (0,))), preferred_element_type=jnp.float32)
        m_scr[...] = m_new

    # ---- normalize, merge heads, wide (tq, C) @ (C, C) output projection ----
    o = acc_scr[...] * pl.reciprocal(l_scr[...], approx=True)             # (H, tq, D)
    o2 = jnp.concatenate([o[h] for h in range(H)], axis=-1)               # (tq, C)
    out = jnp.dot(o2, wo_ref[...], preferred_element_type=jnp.float32) + bo_ref[...]
    o_ref[0] = out.astype(o_ref.dtype)


def _vmem_limit_bytes() -> int:
    """~3/4 of physical VMEM: ~96 MiB on v5e/v6e (128 MiB), ~48 MiB on v7x (64 MiB)."""
    try:
        cap = int(pltpu.get_tpu_info().vmem_capacity_bytes)
    except Exception:
        cap = 64 * 1024 * 1024
    return max(32 * 1024 * 1024, (cap * 3) // 4)


def multi_head_attention(x, wqkv, bqkv, wout, bout, *, num_heads):
    B, T, C = x.shape
    H = num_heads
    assert C % H == 0
    D = C // H

    # Keep the un-split (C, C) weights so in-kernel projections are full-lane matmuls.
    wq, wk, wv = jnp.split(wqkv, 3, axis=-1)                 # each (C, C)
    bq, bk, bv = jnp.split(bqkv.reshape(1, -1), 3, axis=-1)  # each (1, C)
    bo = bout.reshape(1, -1)                                 # (1, C)

    # Query/KV tile size; ragged long T is zero-padded to a multiple of the tile.
    if T <= 128:
        tq, Tp = T, T
    else:
        tq = 128
        Tp = ((T + tq - 1) // tq) * tq
    nq = Tp // tq
    xp = x if Tp == T else jnp.pad(x, ((0, 0), (0, Tp - T), (0, 0)))

    scale = 1.0 / float(D) ** 0.5
    kernel = partial(mha_kernel, scale=scale, tq=tq, tkv=tq, num_heads=H)
    const = lambda b, qi: (0, 0)   # constant block index -> DMA'd once, then reused

    out = pl.pallas_call(
        kernel,
        out_shape=jax.ShapeDtypeStruct((B, Tp, C), x.dtype),
        grid=(B, nq),
        in_specs=[
            pl.BlockSpec((1, Tp, C), lambda b, qi: (b, 0, 0)),  # x (full row; q tile sliced in-kernel)
            pl.BlockSpec((C, C), const),                        # W_q
            pl.BlockSpec((C, C), const),                        # W_k
            pl.BlockSpec((C, C), const),                        # W_v
            pl.BlockSpec((1, C), const),                        # b_q
            pl.BlockSpec((1, C), const),                        # b_k
            pl.BlockSpec((1, C), const),                        # b_v
            pl.BlockSpec((C, C), const),                        # W_out
            pl.BlockSpec((1, C), const),                        # b_out
        ],
        out_specs=pl.BlockSpec((1, tq, C), lambda b, qi: (b, qi, 0)),
        scratch_shapes=[
            pltpu.VMEM((H, Tp, D), jnp.float32),   # K (projected once per batch row)
            pltpu.VMEM((H, Tp, D), jnp.float32),   # V
            pltpu.VMEM((H, tq, 1), jnp.float32),   # m (running max)
            pltpu.VMEM((H, tq, 1), jnp.float32),   # l (running denominator)
            pltpu.VMEM((H, tq, D), jnp.float32),   # acc (running weighted sum)
        ],
        compiler_params=pltpu.CompilerParams(
            # K/V-scratch reuse requires the qi axis to stay sequential & innermost.
            dimension_semantics=("parallel", "arbitrary"),
            vmem_limit_bytes=_vmem_limit_bytes(),
        ),
    )(xp, wq, wk, wv, bq, bk, bv, wout, bo)
    return out if Tp == T else out[:, :T, :]


def reference_mha(x, wqkv, bqkv, wout, bout, *, num_heads):
    """Pure-JAX reference mirroring the PyTorch forward exactly."""
    B, T, C = x.shape
    D = C // num_heads
    qkv = x @ wqkv + bqkv.reshape(-1)
    q, k, v = jnp.split(qkv, 3, axis=-1)
    q = q.reshape(B, T, num_heads, D).transpose(0, 2, 1, 3)
    k = k.reshape(B, T, num_heads, D).transpose(0, 2, 1, 3)
    v = v.reshape(B, T, num_heads, D).transpose(0, 2, 1, 3)
    scores = (q @ k.transpose(0, 1, 3, 2)) / jnp.sqrt(jnp.float32(D))
    mask = jnp.tril(jnp.ones((T, T), dtype=bool))[None, None]
    scores = jnp.where(mask, scores, -jnp.inf)
    attn = jax.nn.softmax(scores, axis=-1)
    out = (attn @ v).transpose(0, 2, 1, 3).reshape(B, T, C)
    return out @ wout + bout.reshape(-1)


if __name__ == "__main__":
    # Shapes consistent with the module: embed_dim=32, num_heads=4, seq_len=8, batch=2
    B, T, C, H = 2, 8, 32, 4

    key = jax.random.PRNGKey(0)
    kx, k1, k2, k3, k4 = jax.random.split(key, 5)

    x = jax.random.normal(kx, (B, T, C), dtype=jnp.float32)
    # Parameters stored as (in_dim, out_dim), i.e. W = torch_linear.weight.T.
    wqkv = jax.random.normal(k1, (C, 3 * C), dtype=jnp.float32) * 0.1
    bqkv = jax.random.normal(k2, (1, 3 * C), dtype=jnp.float32) * 0.1
    wout = jax.random.normal(k3, (C, C), dtype=jnp.float32) * 0.1
    bout = jax.random.normal(k4, (1, C), dtype=jnp.float32) * 0.1

    out = multi_head_attention(x, wqkv, bqkv, wout, bout, num_heads=H)
    out = jax.block_until_ready(out)

    ref = reference_mha(x, wqkv, bqkv, wout, bout, num_heads=H)
    assert out.shape == (B, T, C)
    # Tolerance accommodates pl.reciprocal(approx=True) in the softmax denominator.
    assert jnp.allclose(out, ref, rtol=5e-3, atol=5e-3), "mismatch vs JAX reference"

    print("KERNEL_OK")
</pallas_src>

<mosaic_0001>
module attributes {stable_mosaic.version = 11 : i64} {
  func.func @mha_kernel(%arg0: i32, %arg1: i32, %arg2: memref<1x8x32xf32, #tpu.memory_space<vmem>>, %arg3: memref<32x32xf32, #tpu.memory_space<vmem>>, %arg4: memref<32x32xf32, #tpu.memory_space<vmem>>, %arg5: memref<32x32xf32, #tpu.memory_space<vmem>>, %arg6: memref<1x32xf32, #tpu.memory_space<vmem>>, %arg7: memref<1x32xf32, #tpu.memory_space<vmem>>, %arg8: memref<1x32xf32, #tpu.memory_space<vmem>>, %arg9: memref<32x32xf32, #tpu.memory_space<vmem>>, %arg10: memref<1x32xf32, #tpu.memory_space<vmem>>, %arg11: memref<1x8x32xf32, #tpu.memory_space<vmem>>, %arg12: memref<4x8x8xf32, #tpu.memory_space<vmem>>, %arg13: memref<4x8x8xf32, #tpu.memory_space<vmem>>, %arg14: memref<4x8x1xf32, #tpu.memory_space<vmem>>, %arg15: memref<4x8x1xf32, #tpu.memory_space<vmem>>, %arg16: memref<4x8x8xf32, #tpu.memory_space<vmem>>) attributes {dimension_semantics = [#tpu.dimension_semantics<parallel>, #tpu.dimension_semantics<arbitrary>], iteration_bounds = array<i64: 2, 1>, scalar_prefetch = 0 : i64, scratch_operands = 5 : i64, tpu.core_type = #tpu.core_type<tc>, window_params = [{transform_indices = @transform_0, window_bounds = array<i64: 1, 8, 32>}, {pipeline_mode = #tpu.pipeline_mode<synchronous>, transform_indices = @transform_1, window_bounds = array<i64: 32, 32>}, {pipeline_mode = #tpu.pipeline_mode<synchronous>, transform_indices = @transform_2, window_bounds = array<i64: 32, 32>}, {pipeline_mode = #tpu.pipeline_mode<synchronous>, transform_indices = @transform_3, window_bounds = array<i64: 32, 32>}, {pipeline_mode = #tpu.pipeline_mode<synchronous>, transform_indices = @transform_4, window_bounds = array<i64: 1, 32>}, {pipeline_mode = #tpu.pipeline_mode<synchronous>, transform_indices = @transform_5, window_bounds = array<i64: 1, 32>}, {pipeline_mode = #tpu.pipeline_mode<synchronous>, transform_indices = @transform_6, window_bounds = array<i64: 1, 32>}, {pipeline_mode = #tpu.pipeline_mode<synchronous>, transform_indices = @transform_7, window_bounds = array<i64: 32, 32>}, {pipeline_mode = #tpu.pipeline_mode<synchronous>, transform_indices = @transform_8, window_bounds = array<i64: 1, 32>}, {transform_indices = @transform_9, window_bounds = array<i64: 1, 8, 32>}]} {
    %c0_i32 = arith.constant 0 : i32
    %0 = arith.cmpi eq, %arg1, %c0_i32 : i32
    %1 = arith.extui %0 : i1 to i32
    %c0_i32_0 = arith.constant 0 : i32
    %2 = arith.cmpi ne, %1, %c0_i32_0 : i32
    scf.if %2 {
      %c0_41 = arith.constant 0 : index
      %c0_42 = arith.constant 0 : index
      %c0_43 = arith.constant 0 : index
      %59 = vector.load %arg2[%c0_41, %c0_42, %c0_43] : memref<1x8x32xf32, #tpu.memory_space<vmem>>, vector<1x8x32xf32>
      %60 = vector.shape_cast %59 : vector<1x8x32xf32> to vector<8x32xf32>
      %c0_44 = arith.constant 0 : index
      %c0_45 = arith.constant 0 : index
      %61 = vector.load %arg4[%c0_44, %c0_45] : memref<32x32xf32, #tpu.memory_space<vmem>>, vector<32x32xf32>
      %cst_46 = arith.constant dense<0.000000e+00> : vector<8x32xf32>
      %62 = tpu.matmul %60, %61, %cst_46 {dimension_numbers = #tpu.dot_dimension_numbers<[1], [0], [0], [1], [0, 0, 1, 1], [], []>} : vector<8x32xf32>, vector<32x32xf32>, vector<8x32xf32> -> vector<8x32xf32>
      %c0_47 = arith.constant 0 : index
      %c0_48 = arith.constant 0 : index
      %63 = vector.load %arg7[%c0_47, %c0_48] : memref<1x32xf32, #tpu.memory_space<vmem>>, vector<1x32xf32>
      %64 = vector.broadcast %63 : vector<1x32xf32> to vector<8x32xf32>
      %65 = arith.addf %62, %64 : vector<8x32xf32>
      %c0_49 = arith.constant 0 : index
      %c0_50 = arith.constant 0 : index
      %66 = vector.load %arg5[%c0_49, %c0_50] : memref<32x32xf32, #tpu.memory_space<vmem>>, vector<32x32xf32>
      %cst_51 = arith.constant dense<0.000000e+00> : vector<8x32xf32>
      %67 = tpu.matmul %60, %66, %cst_51 {dimension_numbers = #tpu.dot_dimension_numbers<[1], [0], [0], [1], [0, 0, 1, 1], [], []>} : vector<8x32xf32>, vector<32x32xf32>, vector<8x32xf32> -> vector<8x32xf32>
      %c0_52 = arith.constant 0 : index
      %c0_53 = arith.constant 0 : index
      %68 = vector.load %arg8[%c0_52, %c0_53] : memref<1x32xf32, #tpu.memory_space<vmem>>, vector<1x32xf32>
      %69 = vector.broadcast %68 : vector<1x32xf32> to vector<8x32xf32>
      %70 = arith.addf %67, %69 : vector<8x32xf32>
      %71 = vector.extract_strided_slice %65 {offsets = [0, 0], sizes = [8, 8], strides = [1, 1]} : vector<8x32xf32> to vector<8x8xf32>
      %c0_54 = arith.constant 0 : index
      %c0_55 = arith.constant 0 : index
      %c0_56 = arith.constant 0 : index
      %72 = vector.load %arg12[%c0_54, %c0_55, %c0_56] : memref<4x8x8xf32, #tpu.memory_space<vmem>>, vector<1x8x8xf32>
      %73 = vector.shape_cast %72 : vector<1x8x8xf32> to vector<8x8xf32>
      %74 = vector.shape_cast %71 : vector<8x8xf32> to vector<1x8x8xf32>
      tpu.vector_store %arg12[%c0_54, %c0_55, %c0_56], %74 {strides = array<i32>} : memref<4x8x8xf32, #tpu.memory_space<vmem>>, vector<1x8x8xf32>,
      %75 = vector.extract_strided_slice %70 {offsets = [0, 0], sizes = [8, 8], strides = [1, 1]} : vector<8x32xf32> to vector<8x8xf32>
      %c0_57 = arith.constant 0 : index
      %c0_58 = arith.constant 0 : index
      %c0_59 = arith.constant 0 : index
      %76 = vector.load %arg13[%c0_57, %c0_58, %c0_59] : memref<4x8x8xf32, #tpu.memory_space<vmem>>, vector<1x8x8xf32>
      %77 = vector.shape_cast %76 : vector<1x8x8xf32> to vector<8x8xf32>
      %78 = vector.shape_cast %75 : vector<8x8xf32> to vector<1x8x8xf32>
      tpu.vector_store %arg13[%c0_57, %c0_58, %c0_59], %78 {strides = array<i32>} : memref<4x8x8xf32, #tpu.memory_space<vmem>>, vector<1x8x8xf32>,
      %79 = vector.extract_strided_slice %65 {offsets = [0, 8], sizes = [8, 8], strides = [1, 1]} : vector<8x32xf32> to vector<8x8xf32>
      %c1 = arith.constant 1 : index
      %c0_60 = arith.constant 0 : index
      %c0_61 = arith.constant 0 : index
      %80 = vector.load %arg12[%c1, %c0_60, %c0_61] : memref<4x8x8xf32, #tpu.memory_space<vmem>>, vector<1x8x8xf32>
      %81 = vector.shape_cast %80 : vector<1x8x8xf32> to vector<8x8xf32>
      %82 = vector.shape_cast %79 : vector<8x8xf32> to vector<1x8x8xf32>
      tpu.vector_store %arg12[%c1, %c0_60, %c0_61], %82 {strides = array<i32>} : memref<4x8x8xf32, #tpu.memory_space<vmem>>, vector<1x8x8xf32>,
      %83 = vector.extract_strided_slice %70 {offsets = [0, 8], sizes = [8, 8], strides = [1, 1]} : vector<8x32xf32> to vector<8x8xf32>
      %c1_62 = arith.constant 1 : index
      %c0_63 = arith.constant 0 : index
      %c0_64 = arith.constant 0 : index
      %84 = vector.load %arg13[%c1_62, %c0_63, %c0_64] : memref<4x8x8xf32, #tpu.memory_space<vmem>>, vector<1x8x8xf32>
      %85 = vector.shape_cast %84 : vector<1x8x8xf32> to vector<8x8xf32>
      %86 = vector.shape_cast %83 : vector<8x8xf32> to vector<1x8x8xf32>
      tpu.vector_store %arg13[%c1_62, %c0_63, %c0_64], %86 {strides = array<i32>} : memref<4x8x8xf32, #tpu.memory_space<vmem>>, vector<1x8x8xf32>,
      %87 = vector.extract_strided_slice %65 {offsets = [0, 16], sizes = [8, 8], strides = [1, 1]} : vector<8x32xf32> to vector<8x8xf32>
      %c2 = arith.constant 2 : index
      %c0_65 = arith.constant 0 : index
      %c0_66 = arith.constant 0 : index
      %88 = vector.load %arg12[%c2, %c0_65, %c0_66] : memref<4x8x8xf32, #tpu.memory_space<vmem>>, vector<1x8x8xf32>
      %89 = vector.shape_cast %88 : vector<1x8x8xf32> to vector<8x8xf32>
      %90 = vector.shape_cast %87 : vector<8x8xf32> to vector<1x8x8xf32>
      tpu.vector_store %arg12[%c2, %c0_65, %c0_66], %90 {strides = array<i32>} : memref<4x8x8xf32, #tpu.memory_space<vmem>>, vector<1x8x8xf32>,
      %91 = vector.extract_strided_slice %70 {offsets = [0, 16], sizes = [8, 8], strides = [1, 1]} : vector<8x32xf32> to vector<8x8xf32>
      %c2_67 = arith.constant 2 : index
      %c0_68 = arith.constant 0 : index
      %c0_69 = arith.constant 0 : index
      %92 = vector.load %arg13[%c2_67, %c0_68, %c0_69] : memref<4x8x8xf32, #tpu.memory_space<vmem>>, vector<1x8x8xf32>
      %93 = vector.shape_cast %92 : vector<1x8x8xf32> to vector<8x8xf32>
      %94 = vector.shape_cast %91 : vector<8x8xf32> to vector<1x8x8xf32>
      tpu.vector_store %arg13[%c2_67, %c0_68, %c0_69], %94 {strides = array<i32>} : memref<4x8x8xf32, #tpu.memory_space<vmem>>, vector<1x8x8xf32>,
      %95 = vector.extract_strided_slice %65 {offsets = [0, 24], sizes = [8, 8], strides = [1, 1]} : vector<8x32xf32> to vector<8x8xf32>
      %c3 = arith.constant 3 : index
      %c0_70 = arith.constant 0 : index
      %c0_71 = arith.constant 0 : index
      %96 = vector.load %arg12[%c3, %c0_70, %c0_71] : memref<4x8x8xf32, #tpu.memory_space<vmem>>, vector<1x8x8xf32>
      %97 = vector.shape_cast %96 : vector<1x8x8xf32> to vector<8x8xf32>
      %98 = vector.shape_cast %95 : vector<8x8xf32> to vector<1x8x8xf32>
      tpu.vector_store %arg12[%c3, %c0_70, %c0_71], %98 {strides = array<i32>} : memref<4x8x8xf32, #tpu.memory_space<vmem>>, vector<1x8x8xf32>,
      %99 = vector.extract_strided_slice %70 {offsets = [0, 24], sizes = [8, 8], strides = [1, 1]} : vector<8x32xf32> to vector<8x8xf32>
      %c3_72 = arith.constant 3 : index
      %c0_73 = arith.constant 0 : index
      %c0_74 = arith.constant 0 : index
      %100 = vector.load %arg13[%c3_72, %c0_73, %c0_74] : memref<4x8x8xf32, #tpu.memory_space<vmem>>, vector<1x8x8xf32>
      %101 = vector.shape_cast %100 : vector<1x8x8xf32> to vector<8x8xf32>
      %102 = vector.shape_cast %99 : vector<8x8xf32> to vector<1x8x8xf32>
      tpu.vector_store %arg13[%c3_72, %c0_73, %c0_74], %102 {strides = array<i32>} : memref<4x8x8xf32, #tpu.memory_space<vmem>>, vector<1x8x8xf32>,
    } else {
    }
    %c8_i32 = arith.constant 8 : i32
    %3 = arith.muli %arg1, %c8_i32 : i32
    %4 = tpu.assume_multiple %3, 8 : i32
    %c0 = arith.constant 0 : index
    %5 = arith.index_cast %4 : i32 to index
    %c0_1 = arith.constant 0 : index
    %6 = vector.load %arg2[%c0, %5, %c0_1] : memref<1x8x32xf32, #tpu.memory_space<vmem>>, vector<1x8x32xf32>
    %7 = vector.shape_cast %6 : vector<1x8x32xf32> to vector<8x32xf32>
    %c0_2 = arith.constant 0 : index
    %c0_3 = arith.constant 0 : index
    %8 = vector.load %arg3[%c0_2, %c0_3] : memref<32x32xf32, #tpu.memory_space<vmem>>, vector<32x32xf32>
    %cst = arith.constant dense<0.000000e+00> : vector<8x32xf32>
    %9 = tpu.matmul %7, %8, %cst {dimension_numbers = #tpu.dot_dimension_numbers<[1], [0], [0], [1], [0, 0, 1, 1], [], []>} : vector<8x32xf32>, vector<32x32xf32>, vector<8x32xf32> -> vector<8x32xf32>
    %c0_4 = arith.constant 0 : index
    %c0_5 = arith.constant 0 : index
    %10 = vector.load %arg6[%c0_4, %c0_5] : memref<1x32xf32, #tpu.memory_space<vmem>>, vector<1x32xf32>
    %11 = vector.broadcast %10 : vector<1x32xf32> to vector<8x32xf32>
    %12 = arith.addf %9, %11 : vector<8x32xf32>
    %cst_6 = arith.constant 0.353553385 : f32
    %13 = vector.broadcast %cst_6 : f32 to vector<8x32xf32>
    %14 = arith.mulf %12, %13 : vector<8x32xf32>
    %15 = vector.extract_strided_slice %14 {offsets = [0, 0], sizes = [8, 8], strides = [1, 1]} : vector<8x32xf32> to vector<8x8xf32>
    %16 = vector.extract_strided_slice %14 {offsets = [0, 8], sizes = [8, 8], strides = [1, 1]} : vector<8x32xf32> to vector<8x8xf32>
    %17 = vector.extract_strided_slice %14 {offsets = [0, 16], sizes = [8, 8], strides = [1, 1]} : vector<8x32xf32> to vector<8x8xf32>
    %18 = vector.extract_strided_slice %14 {offsets = [0, 24], sizes = [8, 8], strides = [1, 1]} : vector<8x32xf32> to vector<8x8xf32>
    %19 = vector.shape_cast %15 : vector<8x8xf32> to vector<1x8x8xf32>
    %20 = vector.shape_cast %16 : vector<8x8xf32> to vector<1x8x8xf32>
    %21 = vector.shape_cast %17 : vector<8x8xf32> to vector<1x8x8xf32>
    %22 = vector.shape_cast %18 : vector<8x8xf32> to vector<1x8x8xf32>
    %23 = tpu.concatenate %19, %20, %21, %22 in 0 : vector<1x8x8xf32>, vector<1x8x8xf32>, vector<1x8x8xf32>, vector<1x8x8xf32> -> vector<4x8x8xf32>
    %cst_7 = arith.constant -1.000000e+30 : f32
    %24 = vector.broadcast %cst_7 : f32 to vector<4x8x1xf32>
    %c0_8 = arith.constant 0 : index
    %c0_9 = arith.constant 0 : index
    %c0_10 = arith.constant 0 : index
    %25 = vector.load %arg14[%c0_8, %c0_9, %c0_10] : memref<4x8x1xf32, #tpu.memory_space<vmem>>, vector<4x8x1xf32>
    tpu.vector_store %arg14[%c0_8, %c0_9, %c0_10], %24 {strides = array<i32>} : memref<4x8x1xf32, #tpu.memory_space<vmem>>, vector<4x8x1xf32>,
    %cst_11 = arith.constant 0.000000e+00 : f32
    %26 = vector.broadcast %cst_11 : f32 to vector<4x8x1xf32>
    %c0_12 = arith.constant 0 : index
    %c0_13 = arith.constant 0 : index
    %c0_14 = arith.constant 0 : index
    %27 = vector.load %arg15[%c0_12, %c0_13, %c0_14] : memref<4x8x1xf32, #tpu.memory_space<vmem>>, vector<4x8x1xf32>
    tpu.vector_store %arg15[%c0_12, %c0_13, %c0_14], %26 {strides = array<i32>} : memref<4x8x1xf32, #tpu.memory_space<vmem>>, vector<4x8x1xf32>,
    %cst_15 = arith.constant 0.000000e+00 : f32
    %28 = vector.broadcast %cst_15 : f32 to vector<4x8x8xf32>
    %c0_16 = arith.constant 0 : index
    %c0_17 = arith.constant 0 : index
    %c0_18 = arith.constant 0 : index
    %29 = vector.load %arg16[%c0_16, %c0_17, %c0_18] : memref<4x8x8xf32, #tpu.memory_space<vmem>>, vector<4x8x8xf32>
    tpu.vector_store %arg16[%c0_16, %c0_17, %c0_18], %28 {strides = array<i32>} : memref<4x8x8xf32, #tpu.memory_space<vmem>>, vector<4x8x8xf32>,
    %c1_i32 = arith.constant 1 : i32
    %30 = arith.addi %arg1, %c1_i32 : i32
    %c0_i32_19 = arith.constant 0 : i32
    %31 = arith.subi %30, %c0_i32_19 : i32
    %c1_i32_20 = arith.constant 1 : i32
    %c1_i32_21 = arith.constant 1 : i32
    %32 = arith.subi %c1_i32_20, %c1_i32_21 : i32
    %33 = arith.addi %31, %32 : i32
    %c1_i32_22 = arith.constant 1 : i32
    %34 = arith.divsi %33, %c1_i32_22 : i32
    %c1_i32_23 = arith.constant 1 : i32
    %c0_i32_24 = arith.constant 0 : i32
    %c0_i32_25 = arith.constant 0 : i32
    %35 = arith.subi %34, %c0_i32_25 : i32
    %36 = arith.addi %c0_i32_25, %35 : i32
    %c1_i32_26 = arith.constant 1 : i32
    scf.for %arg17 = %c0_i32_25 to %36 step %c1_i32_26  : i32 {
      %59 = arith.muli %arg17, %c1_i32_23 : i32
      %60 = arith.addi %c0_i32_24, %59 : i32
      %c8_i32_41 = arith.constant 8 : i32
      %61 = arith.muli %60, %c8_i32_41 : i32
      %62 = tpu.assume_multiple %61, 8 : i32
      %c0_42 = arith.constant 0 : index
      %63 = arith.index_cast %62 : i32 to index
      %c0_43 = arith.constant 0 : index
      %64 = vector.load %arg12[%c0_42, %63, %c0_43] : memref<4x8x8xf32, #tpu.memory_space<vmem>>, vector<4x8x8xf32>
      %c0_44 = arith.constant 0 : index
      %65 = arith.index_cast %62 : i32 to index
      %c0_45 = arith.constant 0 : index
      %66 = vector.load %arg13[%c0_44, %65, %c0_45] : memref<4x8x8xf32, #tpu.memory_space<vmem>>, vector<4x8x8xf32>
      %cst_46 = arith.constant dense<0.000000e+00> : vector<4x8x8xf32>
      %67 = tpu.matmul %23, %64, %cst_46 {dimension_numbers = #tpu.dot_dimension_numbers<[2], [2], [1], [1], [0, 0, 0, 1, 1, 1], [0], [0]>} : vector<4x8x8xf32>, vector<4x8x8xf32>, vector<4x8x8xf32> -> vector<4x8x8xf32>
      %c8_i32_47 = arith.constant 8 : i32
      %68 = arith.muli %arg1, %c8_i32_47 : i32
      %69 = tpu.iota {dimensions = array<i32: 0>} : vector<8x8xi32>
      %70 = vector.broadcast %68 : i32 to vector<8x8xi32>
      %71 = arith.addi %70, %69 : vector<8x8xi32>
      %c8_i32_48 = arith.constant 8 : i32
      %72 = arith.muli %60, %c8_i32_48 : i32
      %73 = tpu.iota {dimensions = array<i32: 1>} : vector<8x8xi32>
      %74 = vector.broadcast %72 : i32 to vector<8x8xi32>
      %75 = arith.addi %74, %73 : vector<8x8xi32>
      %76 = arith.cmpi sge, %71, %75 : vector<8x8xi32>
      %77 = vector.shape_cast %76 : vector<8x8xi1> to vector<1x8x8xi1>
      %cst_49 = arith.constant -1.000000e+30 : f32
      %78 = vector.shape_cast %77 : vector<1x8x8xi1> to vector<1x8x8xi1>
      %79 = vector.broadcast %78 : vector<1x8x8xi1> to vector<4x8x8xi1>
      %80 = vector.broadcast %cst_49 : f32 to vector<4x8x8xf32>
      %81 = arith.select %79, %67, %80 : vector<4x8x8xi1>, vector<4x8x8xf32>
      %c0_50 = arith.constant 0 : index
      %c0_51 = arith.constant 0 : index
      %c0_52 = arith.constant 0 : index
      %82 = vector.load %arg14[%c0_50, %c0_51, %c0_52] : memref<4x8x1xf32, #tpu.memory_space<vmem>>, vector<4x8x1xf32>
      %cst_53 = arith.constant dense<0xFF800000> : vector<4x8xf32>
      %83 = vector.multi_reduction <maximumf>, %81, %cst_53 [2] : vector<4x8x8xf32> to vector<4x8xf32>
      %84 = vector.shape_cast %83 : vector<4x8xf32> to vector<4x8x1xf32>
      %85 = arith.maximumf %82, %84 : vector<4x8x1xf32>
      %86 = arith.subf %82, %85 : vector<4x8x1xf32>
      %87 = math.exp %86 : vector<4x8x1xf32>
      %88 = vector.broadcast %85 : vector<4x8x1xf32> to vector<4x8x8xf32>
      %89 = arith.subf %81, %88 : vector<4x8x8xf32>
      %90 = math.exp %89 : vector<4x8x8xf32>
      %c0_54 = arith.constant 0 : index
      %c0_55 = arith.constant 0 : index
      %c0_56 = arith.constant 0 : index
      %91 = vector.load %arg15[%c0_54, %c0_55, %c0_56] : memref<4x8x1xf32, #tpu.memory_space<vmem>>, vector<4x8x1xf32>
      %92 = arith.mulf %87, %91 : vector<4x8x1xf32>
      %cst_57 = arith.constant dense<0.000000e+00> : vector<4x8xf32>
      %93 = vector.multi_reduction <add>, %90, %cst_57 [2] : vector<4x8x8xf32> to vector<4x8xf32>
      %94 = vector.shape_cast %93 : vector<4x8xf32> to vector<4x8x1xf32>
      %95 = arith.addf %92, %94 : vector<4x8x1xf32>
      %c0_58 = arith.constant 0 : index
      %c0_59 = arith.constant 0 : index
      %c0_60 = arith.constant 0 : index
      %96 = vector.load %arg15[%c0_58, %c0_59, %c0_60] : memref<4x8x1xf32, #tpu.memory_space<vmem>>, vector<4x8x1xf32>
      tpu.vector_store %arg15[%c0_58, %c0_59, %c0_60], %95 {strides = array<i32>} : memref<4x8x1xf32, #tpu.memory_space<vmem>>, vector<4x8x1xf32>,
      %c0_61 = arith.constant 0 : index
      %c0_62 = arith.constant 0 : index
      %c0_63 = arith.constant 0 : index
      %97 = vector.load %arg16[%c0_61, %c0_62, %c0_63] : memref<4x8x8xf32, #tpu.memory_space<vmem>>, vector<4x8x8xf32>
      %98 = vector.broadcast %87 : vector<4x8x1xf32> to vector<4x8x8xf32>
      %99 = arith.mulf %98, %97 : vector<4x8x8xf32>
      %cst_64 = arith.constant dense<0.000000e+00> : vector<4x8x8xf32>
      %100 = tpu.matmul %90, %66, %cst_64 {dimension_numbers = #tpu.dot_dimension_numbers<[2], [1], [1], [2], [0, 0, 0, 1, 1, 2], [0], [0]>} : vector<4x8x8xf32>, vector<4x8x8xf32>, vector<4x8x8xf32> -> vector<4x8x8xf32>
      %101 = arith.addf %99, %100 : vector<4x8x8xf32>
      %c0_65 = arith.constant 0 : index
      %c0_66 = arith.constant 0 : index
      %c0_67 = arith.constant 0 : index
      %102 = vector.load %arg16[%c0_65, %c0_66, %c0_67] : memref<4x8x8xf32, #tpu.memory_space<vmem>>, vector<4x8x8xf32>
      tpu.vector_store %arg16[%c0_65, %c0_66, %c0_67], %101 {strides = array<i32>} : memref<4x8x8xf32, #tpu.memory_space<vmem>>, vector<4x8x8xf32>,
      %c0_68 = arith.constant 0 : index
      %c0_69 = arith.constant 0 : index
      %c0_70 = arith.constant 0 : index
      %103 = vector.load %arg14[%c0_68, %c0_69, %c0_70] : memref<4x8x1xf32, #tpu.memory_space<vmem>>, vector<4x8x1xf32>
      tpu.vector_store %arg14[%c0_68, %c0_69, %c0_70], %85 {strides = array<i32>} : memref<4x8x1xf32, #tpu.memory_space<vmem>>, vector<4x8x1xf32>,
    }
    %c0_27 = arith.constant 0 : index
    %c0_28 = arith.constant 0 : index
    %c0_29 = arith.constant 0 : index
    %37 = vector.load %arg16[%c0_27, %c0_28, %c0_29] : memref<4x8x8xf32, #tpu.memory_space<vmem>>, vector<4x8x8xf32>
    %c0_30 = arith.constant 0 : index
    %c0_31 = arith.constant 0 : index
    %c0_32 = arith.constant 0 : index
    %38 = vector.load %arg15[%c0_30, %c0_31, %c0_32] : memref<4x8x1xf32, #tpu.memory_space<vmem>>, vector<4x8x1xf32>
    %39 = tpu.reciprocal %38 {approx = true} : vector<4x8x1xf32> -> vector<4x8x1xf32>
    %40 = vector.broadcast %39 : vector<4x8x1xf32> to vector<4x8x8xf32>
    %41 = arith.mulf %37, %40 : vector<4x8x8xf32>
    %42 = vector.extract_strided_slice %41 {offsets = [0, 0, 0], sizes = [1, 8, 8], strides = [1, 1, 1]} : vector<4x8x8xf32> to vector<1x8x8xf32>
    %43 = vector.shape_cast %42 : vector<1x8x8xf32> to vector<8x8xf32>
    %44 = vector.extract_strided_slice %41 {offsets = [1, 0, 0], sizes = [1, 8, 8], strides = [1, 1, 1]} : vector<4x8x8xf32> to vector<1x8x8xf32>
    %45 = vector.shape_cast %44 : vector<1x8x8xf32> to vector<8x8xf32>
    %46 = vector.extract_strided_slice %41 {offsets = [2, 0, 0], sizes = [1, 8, 8], strides = [1, 1, 1]} : vector<4x8x8xf32> to vector<1x8x8xf32>
    %47 = vector.shape_cast %46 : vector<1x8x8xf32> to vector<8x8xf32>
    %48 = vector.extract_strided_slice %41 {offsets = [3, 0, 0], sizes = [1, 8, 8], strides = [1, 1, 1]} : vector<4x8x8xf32> to vector<1x8x8xf32>
    %49 = vector.shape_cast %48 : vector<1x8x8xf32> to vector<8x8xf32>
    %50 = tpu.concatenate %43, %45, %47, %49 in 1 : vector<8x8xf32>, vector<8x8xf32>, vector<8x8xf32>, vector<8x8xf32> -> vector<8x32xf32>
    %c0_33 = arith.constant 0 : index
    %c0_34 = arith.constant 0 : index
    %51 = vector.load %arg9[%c0_33, %c0_34] : memref<32x32xf32, #tpu.memory_space<vmem>>, vector<32x32xf32>
    %cst_35 = arith.constant dense<0.000000e+00> : vector<8x32xf32>
    %52 = tpu.matmul %50, %51, %cst_35 {dimension_numbers = #tpu.dot_dimension_numbers<[1], [0], [0], [1], [0, 0, 1, 1], [], []>} : vector<8x32xf32>, vector<32x32xf32>, vector<8x32xf32> -> vector<8x32xf32>
    %c0_36 = arith.constant 0 : index
    %c0_37 = arith.constant 0 : index
    %53 = vector.load %arg10[%c0_36, %c0_37] : memref<1x32xf32, #tpu.memory_space<vmem>>, vector<1x32xf32>
    %54 = vector.broadcast %53 : vector<1x32xf32> to vector<8x32xf32>
    %55 = arith.addf %52, %54 : vector<8x32xf32>
    %c0_38 = arith.constant 0 : index
    %c0_39 = arith.constant 0 : index
    %c0_40 = arith.constant 0 : index
    %56 = vector.load %arg11[%c0_38, %c0_39, %c0_40] : memref<1x8x32xf32, #tpu.memory_space<vmem>>, vector<1x8x32xf32>
    %57 = vector.shape_cast %56 : vector<1x8x32xf32> to vector<8x32xf32>
    %58 = vector.shape_cast %55 : vector<8x32xf32> to vector<1x8x32xf32>
    tpu.vector_store %arg11[%c0_38, %c0_39, %c0_40], %58 {strides = array<i32>} : memref<1x8x32xf32, #tpu.memory_space<vmem>>, vector<1x8x32xf32>,
    return
  }
  func.func @transform_0(%arg0: i32, %arg1: i32) -> (i32, i32, i32) {
    %c0_i32 = arith.constant 0 : i32
    %c0_i32_0 = arith.constant 0 : i32
    %c0_i32_1 = arith.constant 0 : i32
    return %arg0, %c0_i32, %c0_i32_0 : i32, i32, i32
  }
  func.func @transform_1(%arg0: i32, %arg1: i32) -> (i32, i32) {
    %c0_i32 = arith.constant 0 : i32
    %c0_i32_0 = arith.constant 0 : i32
    %c0_i32_1 = arith.constant 0 : i32
    return %c0_i32, %c0_i32_0 : i32, i32
  }
  func.func @transform_2(%arg0: i32, %arg1: i32) -> (i32, i32) {
    %c0_i32 = arith.constant 0 : i32
    %c0_i32_0 = arith.constant 0 : i32
    %c0_i32_1 = arith.constant 0 : i32
    return %c0_i32, %c0_i32_0 : i32, i32
  }
  func.func @transform_3(%arg0: i32, %arg1: i32) -> (i32, i32) {
    %c0_i32 = arith.constant 0 : i32
    %c0_i32_0 = arith.constant 0 : i32
    %c0_i32_1 = arith.constant 0 : i32
    return %c0_i32, %c0_i32_0 : i32, i32
  }
  func.func @transform_4(%arg0: i32, %arg1: i32) -> (i32, i32) {
    %c0_i32 = arith.constant 0 : i32
    %c0_i32_0 = arith.constant 0 : i32
    %c0_i32_1 = arith.constant 0 : i32
    return %c0_i32, %c0_i32_0 : i32, i32
  }
  func.func @transform_5(%arg0: i32, %arg1: i32) -> (i32, i32) {
    %c0_i32 = arith.constant 0 : i32
    %c0_i32_0 = arith.constant 0 : i32
    %c0_i32_1 = arith.constant 0 : i32
    return %c0_i32, %c0_i32_0 : i32, i32
  }
  func.func @transform_6(%arg0: i32, %arg1: i32) -> (i32, i32) {
    %c0_i32 = arith.constant 0 : i32
    %c0_i32_0 = arith.constant 0 : i32
    %c0_i32_1 = arith.constant 0 : i32
    return %c0_i32, %c0_i32_0 : i32, i32
  }
  func.func @transform_7(%arg0: i32, %arg1: i32) -> (i32, i32) {
    %c0_i32 = arith.constant 0 : i32
    %c0_i32_0 = arith.constant 0 : i32
    %c0_i32_1 = arith.constant 0 : i32
    return %c0_i32, %c0_i32_0 : i32, i32
  }
  func.func @transform_8(%arg0: i32, %arg1: i32) -> (i32, i32) {
    %c0_i32 = arith.constant 0 : i32
    %c0_i32_0 = arith.constant 0 : i32
    %c0_i32_1 = arith.constant 0 : i32
    return %c0_i32, %c0_i32_0 : i32, i32
  }
  func.func @transform_9(%arg0: i32, %arg1: i32) -> (i32, i32, i32) {
    %c0_i32 = arith.constant 0 : i32
    %c0_i32_0 = arith.constant 0 : i32
    return %arg0, %arg1, %c0_i32 : i32, i32, i32
  }
}

</mosaic_0001>

<bundles_post_ra>
// kernel: tpu_custom_call.1
= control target key start
LH: loop header
LB: loop body
LE: loop exit
PB: predicated region body
PF: predicated region fallthrough
CT: control target
= control target key end

     0   :  { %s2908_s0 = inlined_call_operand.hbm [shape: f32[2,8,32], index: 0, kind: input, shape index: {}]   ;;  %s2909_s1 = inlined_call_operand.hbm [shape: f32[32,32], index: 1, kind: input, shape index: {}]   ;;  %s2910_s2 = inlined_call_operand.hbm [shape: f32[32,32], index: 2, kind: input, shape index: {}]   ;;  %s2911_s3 = inlined_call_operand.hbm [shape: f32[32,32], index: 3, kind: input, shape index: {}]   ;;  %s2912_s4 = inlined_call_operand.vmem [shape: f32[1,32], index: 4, kind: input, shape index: {}]   ;;  %s2913_s5 = inlined_call_operand.vmem [shape: f32[1,32], index: 5, kind: input, shape index: {}]   ;;  %s2914_s6 = inlined_call_operand.vmem [shape: f32[1,32], index: 6, kind: input, shape index: {}]   ;;  %s2915_s7 = inlined_call_operand.hbm [shape: f32[32,32], index: 7, kind: input, shape index: {}]   ;;  %s2916_s8 = inlined_call_operand.vmem [shape: f32[1,32], index: 8, kind: input, shape index: {}]   ;;  %s2917_s9 = inlined_call_operand.hbm [shape: f32[2,8,32], index: 9, kind: output, shape index: {}]  }
   0x1   :  { %2924 = sst [smem:[#allocation22_spill]] %s2909_s1 }
   0x2   :  { %2925 = sst [smem:[#allocation23_spill]] %s2916_s8 }
   0x3   :  { %2926 = sst [smem:[#allocation24_spill]] %s2917_s9 }
   0x4   :  { %14 = vsyncpa [#allocation8], 0 }
   0x5   :  { %16 = vsyncpa [#allocation8 + $0x1], 0 }
   0x6   :  { %17 = vsyncpa [#allocation11], 0 }
   0x7   :  { %18 = vsyncpa [#allocation14], 0 }
   0x8   :  { %19 = vsyncpa [#allocation9], 0 }
   0x9   :  { %21 = vsyncpa [#allocation9 + $0x1], 0  ;;  %s2429_s30 = smov 0   ;;  %s2431_s10 = smov 0  }
   0xa   :  { %s2433_s11 = smov 0   ;;  %s2435_s12 = smov 0  }
   0xb   :  { %s2437_s13 = smov 0   ;;  %s2439_s14 = smov 0  }
   0xc LB: > { %2927 = sst [smem:[#allocation21_spill]] %s2343_s12  ;;  %s2918_s15 = sadd.s32 4294967295, %s2351_s14   ;;  %s2351_s14 = sphi %s2439_s14, %s27_s14   ;;  %s2347_s13 = sphi %s2437_s13, %s2952_s13   ;;  %s2343_s12 = sphi %s2435_s12, %s2951_s12   ;;  %s2339_s11 = sphi %s2433_s11, %s2950_s11   ;;  %s2335_s10 = sphi %s2431_s10, %s2949_s10   ;;  %s2331_s30 = sphi %s2429_s30, %s2948_s30  }
   0xd   : > { %p1776_p0 = scmp.ge.s32.totalorder %s2351_s14, 1  ;;  %p2463_p1 = scmp.eq.s32.totalorder %s2918_s15, 0 }
   0xe   : > { %p266_p2 = scmp.lt.s32.totalorder %s2351_s14, 3  ;;  %s2357_s18 = smov [#allocation10]  }
   0xf   : > { %s2928_s16 = scalar_select %p2463_p1, 1, 0 }
  0x10   : > { %p2468_p3 = pnand %p1776_p0, %p266_p2  ;;  %s278_s19 = sshll.u32 %s2357_s18, 4  ;;  %s2472_s19 = int_to_ptr.vmem [resolvable:$true] %s278_s19 }
  0x11   : > { %s2358_s21 = smov [#allocation13]   ;;  %s2359_s23 = smov [#allocation12]  }
  0x12   : > { %s2929_s17 = scalar_select %p2468_p3, 1, 0 }
  0x13   : > { %p1980_p4 = pneg %p2468_p3  ;;  %s304_s22 = sshll.u32 %s2358_s21, 4  ;;  %s2483_s22 = int_to_ptr.vmem [resolvable:$true] %s304_s22 }
  0x14   : > { %s2485_s24 = sshll.u32 %s2359_s23, 4  ;;  %s2931_s1 = sld [smem:[#allocation22_spill]]  ;;  %s292_s24 = int_to_ptr.vmem [resolvable:$true] %s2485_s24 }
  0x15   : > { %p2479_p6 = pnand %p1980_p4, %p2463_p1 }
  0x17   : > { %p2495_p8 = pneg %p2479_p6 }
  0x1a   : > { %s2115_s27 = scalar_lea.hbm %s2931_s1, 512 }
  0x1b   : > { %p2116_p7 = scmp.ne.s32.totalorder %s2931_s1, %s2115_s27  ;;  %p2122_p11 = scmp.lt.u32.totalorder %s2115_s27, %s2931_s1 }
  0x1d   : > { %p2118_p9 = pnand %p2495_p8, %p2116_p7 }
  0x1f   : > { %p2119_p10 = pneg %p2118_p9 }
  0x21   : > { %p2124_p12 = pnand %p2122_p11, %p2119_p10 }
  0x23   : > { %2127 = shalt.err (!%p2124_p12)
}
  0x24   : > { %s2128_s25 = scalar_lea.vmem %s2472_s19, 512  ;;  %p2136_p4 = scmp.lt.s32.totalorder %s2472_s19, %s2472_s19 }
  0x25   : > { %p2129_p13 = scmp.ne.s32.totalorder %s2472_s19, %s2128_s25  ;;  %p2137_p5 = scmp.lt.s32.totalorder %s2128_s25, %s2128_s25 }
  0x27   : > { %p2131_p0 = pnand %p2129_p13, %p2495_p8  ;;  %p2138_p7 = por %p2137_p5, %p2136_p4 }
  0x29   : > { %p2132_p2 = pneg %p2131_p0 }
  0x2b   : > { %p2139_p9 = pnand %p2138_p7, %p2132_p2 }
  0x2d   : > { %2142 = shalt.err (!%p2139_p9)
}
  0x2e   : > { %s2360_s26 = smov 128   ;;  %s2361_s27 = smov 8  }
  0x2f   : > { %1983 = dma.hbm_to_vmem [thread:$0]  (!%p2479_p6), %s2931_s1, 512, %s2472_s19, [#allocation11], %s2360_s26, %s2360_s26, %s2361_s27  }
  0x30   : > { %s2143_s25 = scalar_lea.hbm %s2911_s3, 512 }
  0x31   : > { %p2144_p5 = scmp.ne.s32.totalorder %s2911_s3, %s2143_s25  ;;  %p2150_p12 = scmp.lt.u32.totalorder %s2143_s25, %s2911_s3 }
  0x33   : > { %p2146_p10 = pnand %p2144_p5, %p2495_p8 }
  0x35   : > { %p2147_p11 = pneg %p2146_p10 }
  0x37   : > { %p2152_p13 = pnand %p2150_p12, %p2147_p11 }
  0x39   : > { %2155 = shalt.err (!%p2152_p13)
}
  0x3a   : > { %s2156_s19 = scalar_lea.vmem %s2483_s22, 512  ;;  %p2164_p7 = scmp.lt.s32.totalorder %s2483_s22, %s2483_s22 }
  0x3b   : > { %p2157_p0 = scmp.ne.s32.totalorder %s2483_s22, %s2156_s19  ;;  %p2165_p9 = scmp.lt.s32.totalorder %s2156_s19, %s2156_s19 }
  0x3d   : > { %p2159_p2 = pnand %p2157_p0, %p2495_p8  ;;  %p2166_p5 = por %p2165_p9, %p2164_p7 }
  0x3f   : > { %p2160_p4 = pneg %p2159_p2 }
  0x41   : > { %p2167_p10 = pnand %p2166_p5, %p2160_p4 }
  0x43   : > { %2170 = shalt.err (!%p2167_p10)
}
  0x44   : > { %1989 = dma.hbm_to_vmem [thread:$0]  (!%p2479_p6), %s2911_s3, 512, %s2483_s22, [#allocation14], %s2360_s26, %s2360_s26, %s2361_s27  }
  0x45   : > { %s2171_s28 = scalar_lea.hbm %s2910_s2, 512 }
  0x46   : > { %p2172_p11 = scmp.ne.s32.totalorder %s2910_s2, %s2171_s28  ;;  %p2178_p0 = scmp.lt.u32.totalorder %s2171_s28, %s2910_s2 }
  0x48   : > { %p2174_p12 = pnand %p2172_p11, %p2495_p8 }
  0x4a   : > { %p2175_p13 = pneg %p2174_p12 }
  0x4c   : > { %p2180_p2 = pnand %p2178_p0, %p2175_p13 }
  0x4e   : > { %2183 = shalt.err (!%p2180_p2)
}
  0x4f   : > { %s2184_s19 = scalar_lea.vmem %s292_s24, 512  ;;  %p2192_p5 = scmp.lt.s32.totalorder %s292_s24, %s292_s24 }
  0x50   : > { %p2185_p4 = scmp.ne.s32.totalorder %s292_s24, %s2184_s19  ;;  %p2193_p10 = scmp.lt.s32.totalorder %s2184_s19, %s2184_s19 }
  0x52   : > { %p2187_p7 = pnand %p2185_p4, %p2495_p8  ;;  %p2194_p3 = por %p2193_p10, %p2192_p5 }
  0x54   : > { %p2188_p9 = pneg %p2187_p7 }
  0x56   : > { %p2195_p1 = pnand %p2194_p3, %p2188_p9 }
  0x58   : > { %2198 = shalt.err (!%p2195_p1)
}
  0x59   : > { %1986 = dma.hbm_to_vmem [thread:$0]  (!%p2479_p6), %s2910_s2, 512, %s292_s24, [#allocation11], %s2360_s26, %s2360_s26, %s2361_s27  }
  0x5a   : > { %s2362_s9 = smov [#allocation15]   ;;  %s2199_s29 = scalar_lea.hbm %s2915_s7, 512 }
  0x5b   : > { %s326_s12 = sshll.u32 %s2362_s9, 4  ;;  %p2200_p1 = scmp.ne.s32.totalorder %s2915_s7, %s2199_s29  ;;  %s327_s12 = int_to_ptr.vmem [resolvable:$true] %s326_s12 }
  0x5c   : > { %p2206_p12 = scmp.lt.u32.totalorder %s2199_s29, %s2915_s7 }
  0x5d   : > { %p2202_p3 = pnand %p2200_p1, %p2495_p8 }
  0x5f   : > { %p2203_p11 = pneg %p2202_p3 }
  0x61   : > { %p2208_p13 = pnand %p2206_p12, %p2203_p11 }
  0x63   : > { %2211 = shalt.err (!%p2208_p13)
}
  0x64   : > { %s2212_s24 = scalar_lea.vmem %s327_s12, 512  ;;  %p2220_p7 = scmp.lt.s32.totalorder %s327_s12, %s327_s12 }
  0x65   : > { %p2213_p0 = scmp.ne.s32.totalorder %s327_s12, %s2212_s24  ;;  %p2221_p9 = scmp.lt.s32.totalorder %s2212_s24, %s2212_s24 }
  0x67   : > { %p2215_p2 = pnand %p2213_p0, %p2495_p8  ;;  %p2222_p5 = por %p2221_p9, %p2220_p7 }
  0x69   : > { %p2216_p4 = pneg %p2215_p2 }
  0x6b   : > { %p2223_p10 = pnand %p2222_p5, %p2216_p4 }
  0x6d   : > { %2226 = shalt.err (!%p2223_p10)
}
  0x6e   : > { %1992 = dma.hbm_to_vmem [thread:$0]  (!%p2479_p6), %s2915_s7, 512, %s327_s12, [#allocation14], %s2360_s26, %s2360_s26, %s2361_s27  }
  0x6f   : > { %s1775_s20 = sadd.s32 4294967294, %s2351_s14   ;;  %s39_s18 = sadd.s32 1, %s2347_s13 }
  0x70   : > { %p41_p8 = scmp.ge.s32.totalorder %s39_s18, 2  ;;  %s46_s9 = sadd.s32 1, %s2339_s11 }
  0x71   : > { %p53_p1 = scmp.ne.s32.totalorder %s2339_s11, %s2335_s10  ;;  %p54_p3 = scmp.eq.s32.totalorder %s2351_s14, 0 }
  0x72   : > { %s2954_s18 = smov (%p41_p8, %s39_s18), 0  ;;  %p59_p12 = scmp.ne.s32.totalorder %s2335_s10, %s2331_s30 }
  0x73   : > { %p2596_p11 = por %p54_p3, %p53_p1  ;;  %s43_s26 = ssub.s32 %s2347_s13, %s2954_s18 }
  0x74   : > { %s2934_s27 = sadd.s32 4294967295, %s2351_s14   ;;  %p44_p13 = scmp.eq.s32.totalorder %s43_s26, 0 }
  0x75   : > { %p253_p6 = scmp.eq.s32.totalorder %s2934_s27, 1  ;;  %p2935_p0 = scmp.ne.s32.totalorder %s2928_s16, 0 }
  0x76   : > { %p259_p7 = scmp.eq.s32.totalorder %s1775_s20, 1  ;;  %p2005_p5 = scmp.lt.s32.totalorder %s2351_s14, 2 }
  0x77   : > { %p2608_p2 = por %p2935_p0, %p59_p12  ;;  %p2612_p4 = por %p253_p6, %p53_p1 }
  0x78   : > { %s2617_s29 = scalar_select %p44_p13, %s2339_s11, %s46_s9  }
  0x79   : > { %s2937_s28 = scalar_select %p2612_p4, 1, 0 }
  0x7a   : > { %p2619_p9 = por %p259_p7, %p59_p12  ;;  %s343_s23 = sand.u32 1, %s2339_s11  }
  0x7b   : > { %s1783_s25 = sshll.u32 %s2347_s13, 7  ;;  %s1782_s19 = sshll.u32 %s343_s23, 3 }
  0x7c   : > { %s2938_s21 = scalar_select %p2619_p9, 1, 0 }
  0x7d   : > { %s2629_s8 = scalar_lea.hbm %s2908_s0, %s1783_s25  ;;  %s347_s20 = scalar_lea.vmem [#allocation7], %s1782_s19 }
  0x7e   : > { %s354_s9 = sshll.u32 %s347_s20, 4  ;;  %p2633_p10 = pnand %p2005_p5, %p2596_p11  ;;  %s2637_s9 = int_to_ptr.vmem [resolvable:$true] %s354_s9 }
  0x7f   : > { %s344_s27 = scalar_lea.sflag [#allocation8], %s343_s23  ;;  %s2227_s1 = scalar_lea.hbm %s2629_s8, 128 }
  0x80   : > { %p2228_p8 = scmp.ne.s32.totalorder %s2629_s8, %s2227_s1  ;;  %p2229_p1 = pneg %p2633_p10 }
  0x81   : > { %s2232_s15 = scalar_lea.hbm %s2908_s0, 256  ;;  %p2233_p11 = scmp.lt.u32.totalorder %s2629_s8, %s2908_s0 }
  0x82   : > { %p2230_p3 = pnand %p2229_p1, %p2228_p8  ;;  %p2234_p6 = scmp.lt.u32.totalorder %s2232_s15, %s2227_s1 }
  0x83   : > { %p2236_p0 = scmp.lt.u32.totalorder %s2227_s1, %s2629_s8 }
  0x84   : > { %p2231_p12 = pneg %p2230_p3  ;;  %p2235_p13 = por %p2234_p6, %p2233_p11 }
  0x86   : > { %p2237_p7 = por %p2236_p0, %p2235_p13 }
  0x88   : > { %p2238_p5 = pnand %p2237_p7, %p2231_p12 }
  0x8a   : > { %2241 = shalt.err (!%p2238_p5)
}
  0x8b   : > { %s2242_s23 = scalar_lea.vmem %s2637_s9, 128  ;;  %s2363_s20 = smov [#allocation7]  }
  0x8c   : > { %p2243_p8 = scmp.ne.s32.totalorder %s2637_s9, %s2242_s23  ;;  %s2247_s25 = sshll.u32 %s2363_s20, 4  ;;  %s2248_s25 = int_to_ptr.vmem [resolvable:$false] %s2247_s25 }
  0x8d   : > { %s2249_s19 = scalar_lea.vmem %s2248_s25, 256  ;;  %p2250_p4 = scmp.lt.s32.totalorder %s2637_s9, %s2248_s25 }
  0x8e   : > { %p2245_p3 = pnand %p2243_p8, %p2229_p1  ;;  %p2251_p11 = scmp.lt.s32.totalorder %s2249_s19, %s2242_s23 }
  0x90   : > { %p2246_p9 = pneg %p2245_p3  ;;  %p2252_p6 = por %p2251_p11, %p2250_p4 }
  0x92   : > { %p2253_p13 = pnand %p2252_p6, %p2246_p9 }
  0x94   : > { %2256 = shalt.err (!%p2253_p13)
}
  0x95   : > { %1996 = dma.hbm_to_vmem [thread:$0]  (!%p2633_p10), %s2629_s8, 128, %s2637_s9, %s344_s27  }
  0x96   : > { %p2940_p12 = scmp.ne.s32.totalorder %s2929_s17, 0 }
  0x97   : > { %s2667_s1 = sand.u32 (!%p2940_p12), 1, %s2335_s10  }
  0x98   : > { %363 = sbr.rel (%p2940_p12) target bundleno = 1725 (0x6bd), region = 56  ;;  %s1785_s15 = sshll.u32 (!%p2940_p12), %s2667_s1, 3 }
  0x99   : > { %s366_s24 = scalar_lea.sflag (!%p2940_p12), [#allocation8], %s2667_s1  ;;  %s2673_s22 = scalar_lea.vmem (!%p2940_p12), [#allocation7], %s1785_s15 }
  0x9f   : > { %2314 = dma.done.wait (%p2608_p2), %s366_s24, 128  }
  0xa0   : > { %2316 = vsyncadd (%p2608_p2), %s366_s24, 4294967168  ;;  %p2941_p4 = scmp.ne.s32.totalorder %s2928_s16, 0 }
  0xa2   : > { %2318 = dma.done.wait (%p2941_p4), [#allocation11], 1024  }
  0xa3   : > { %2320 = vsyncadd (%p2941_p4), [#allocation11], 4294966272 }
  0xa4   : > { %2322 = dma.done.wait (%p2941_p4), [#allocation14], 1024  }
  0xa5   : > { %2324 = vsyncadd (%p2941_p4), [#allocation14], 4294966272  ;;  %v2364_v0 = vmov 0.0|0.0   ;;  %vm722_vm0 = vcmask 7168   ;;  %vm2365_vm1 = vmmov 0   ;;  %v2366_v1 = vmov 0.0  }
  0xa6   : > { %1936 = vmatprep.subr.bf16.mxu0 %v2364_v0  ;;  %1942 = vmatprep.subr.bf16.mxu1 %v2364_v0  ;;  %v2367_v2 = vmov -1e+30   ;;  %727 = vst.msk [vmem:[#allocation5] sm:$0xff] %vm722_vm0, %v2366_v1  ;;  %728 = vst.msk [vmem:[#allocation5 + $0x8] sm:$0xff] %vm722_vm0, %v2366_v1  ;;  %v425_v3 = vld [vmem:[#allocation12] sm:$0xff]  ;;  %v426_v4 = vld [vmem:[#allocation12 + $0x8] sm:$0xff] }
  0xa7   : > { %1860 = vmatprep.mubr.msk.f32.mxu0 %vm2365_vm1, %v2366_v1  ;;  %723 = vst.msk [vmem:[#allocation4] sm:$0xff] %vm722_vm0, %v2367_v2  ;;  %724 = vst.msk [vmem:[#allocation4 + $0x8] sm:$0xff] %vm722_vm0, %v2367_v2  ;;  %1871 = vmatprep.mubr.msk.f32.mxu1 %vm2365_vm1, %v2366_v1  ;;  %v510_v5 = vld [vmem:[#allocation13] sm:$0xff]  ;;  %v1937_v6 = vpack.c.bf16 %v426_v4, %v425_v3  ;;  %v511_v7 = vld [vmem:[#allocation13 + $0x8] sm:$0xff]  ;;  %vm436_vm2 = vcmask 261120   ;;  %vm591_vm3 = vcmask 64512  }
  0xa8   : > { %725 = vst.msk [vmem:[#allocation4 + $0x10] sm:$0xff] %vm722_vm0, %v2367_v2  ;;  %726 = vst.msk [vmem:[#allocation4 + $0x18] sm:$0xff] %vm722_vm0, %v2367_v2  ;;  %v427_v8 = vld [vmem:[#allocation12 + $0x10] sm:$0xff]  ;;  %v428_v9 = vld [vmem:[#allocation12 + $0x18] sm:$0xff]  ;;  %v1943_v10 = vpack.c.bf16 %v511_v7, %v510_v5  ;;  %s2368_s9 = smov 112   ;;  %s2369_s26 = smov 120  }
  0xa9   : > { %729 = vst.msk [vmem:[#allocation5 + $0x10] sm:$0xff] %vm722_vm0, %v2366_v1  ;;  %730 = vst.msk [vmem:[#allocation5 + $0x18] sm:$0xff] %vm722_vm0, %v2366_v1  ;;  %v512_v11 = vld [vmem:[#allocation13 + $0x10] sm:$0xff]  ;;  %v513_v12 = vld [vmem:[#allocation13 + $0x18] sm:$0xff]  ;;  %1938 = vmatpush3.bf16.msra.mxu0 %v1937_v6  ;;  %v1940_v13 = vpack.c.bf16 %v428_v9, %v427_v8  ;;  %s2370_s20 = smov 104   ;;  %s2753_s25 = scalar_lea.vmem [#allocation16], %s1785_s15 }
  0xaa   : > { %1939 = vmatprep.subr.bf16.mxu0 %v2364_v0  ;;  %1944 = vmatpush3.bf16.msra.mxu1 %v1943_v10  ;;  %v1946_v14 = vpack.c.bf16 %v513_v12, %v512_v11  ;;  %v629_v15 = vld [vmem:[#allocation10] sm:$0xff]  ;;  %v630_v16 = vld [vmem:[#allocation10 + $0x8] sm:$0xff]  ;;  %v424_v17 = vld [vmem:[%s2673_s22] sm:$0xff]  ;;  %732 = vst.msk [vmem:[#allocation6] sm:$0xff] %vm591_vm3, %v2366_v1  ;;  %s2755_s19 = smov 0  }
  0xab   : > { %1945 = vmatprep.subr.bf16.mxu1 %v2364_v0  ;;  %v1949_v18 = vpack.c.bf16 %v630_v16, %v629_v15  ;;  %v631_v19 = vld [vmem:[#allocation10 + $0x10] sm:$0xff]  ;;  %v632_v20 = vld [vmem:[#allocation10 + $0x18] sm:$0xff]  ;;  %733 = vst.msk [vmem:[#allocation6 + $0x8] sm:$0xff] %vm591_vm3, %v2366_v1  ;;  %734 = vst.msk [vmem:[#allocation6 + $0x10] sm:$0xff] %vm591_vm3, %v2366_v1 }
  0xac   : > { %v1952_v21 = vpack.c.bf16 %v632_v20, %v631_v19  ;;  %735 = vst.msk [vmem:[#allocation6 + $0x18] sm:$0xff] %vm591_vm3, %v2366_v1  ;;  %v1791_v22 = vld [vmem:[%s2913_s5] ss:$0 sm:$0xff] }
  0xad   : > { %1941 = vmatpush3.bf16.msra.mxu0 %v1940_v13  ;;  %v1793_v23 = vld [vmem:[%s2914_s6] ss:$0 sm:$0xff] }
  0xae   : > { %1947 = vmatpush3.bf16.msra.mxu1 %v1946_v14  ;;  %1948 = vmatprep.subr.bf16.mxu0 %v2364_v0  ;;  %v1795_v30 = vld [vmem:[%s2912_s4] ss:$0 sm:$0xff] }
  0xb0   : > { %1861 = vmatmul.mubr.msk.f32.vlgmr.msra.gmra.mrb[0].mxu0 %vm436_vm2, %v424_v17 }
  0xb1   : > { %1950 = vmatpush3.bf16.msra.mxu0 %v1949_v18  ;;  %1872 = vmatmul.mubr.msk.f32.vlgmr.msra.gmra.mrb[0].mxu1 %vm436_vm2, %v424_v17 }
  0xb2   : > { %1951 = vmatprep.subr.bf16.mxu0 %v2364_v0  ;;  %1882 = vmatprep.mubr.msk.f32.mxu0 %vm2365_vm1, %v2366_v1 }
  0xb5   : > { %1953 = vmatpush3.bf16.msra.mxu0 %v1952_v21 }
  0xb8   : > { %1883 = vmatmul.mubr.msk.f32.vlgmr.msra.gmra.mrb[2].mxu0 %vm436_vm2, %v424_v17 }
 0x183   : > { %v506_v24 = vpop.f32.mrb[0].mxu0 }
 0x184   : > { %v507_v25 = vadd.f32 %v1791_v22, %v506_v24  ;;  %v1862_v26 = vpop.f32.mrb[1].mxu0  ;;  %v587_v27 = vpop.f32.mrb[0].mxu1 }
 0x185   : > { %v588_v28 = vadd.f32 %v1793_v23, %v587_v27  ;;  %v1873_v29 = vpop.f32.mrb[1].mxu1 }
 0x186   : > { %592 = vst.msk [vmem:[#allocation2] sm:$0xff] %vm591_vm3, %v507_v25  ;;  %606 = vrot.lane.b32.xlu1 %v507_v25, %s2368_s9  ;;  %595 = vrot.lane.b32.xlu0 %v507_v25, %s2369_s26 }
 0x187   : > { %593 = vst.msk [vmem:[#allocation3] sm:$0xff] %vm591_vm3, %v588_v28 }
 0x18a   : > { %611 = vrot.lane.b32.xlu1 %v588_v28, %s2368_s9  ;;  %601 = vrot.lane.b32.xlu0 %v588_v28, %s2369_s26 }
 0x18b   : > { %v710_v31 = vpop.f32.mrb[2].mxu0 }
 0x18c   : > { %v711_v32 = vadd.f32 %v1795_v30, %v710_v31  ;;  %v1884_v33 = vpop.f32.mrb[3].mxu0 }
 0x18e   : > { %v2734_v34 = vmul.f32 0.35355338, %v711_v32  ;;  %621 = vrot.lane.b32.xlu1 %v588_v28, %s2370_s20  ;;  %616 = vrot.lane.b32.xlu0 %v507_v25, %s2370_s20 }
 0x192   : > { %718 = vrot.lane.b32.xlu1 %v2734_v34, %s2368_s9  ;;  %716 = vrot.lane.b32.xlu0 %v2734_v34, %s2369_s26 }
 0x196   : > { %720 = vrot.lane.b32.xlu0 %v2734_v34, %s2370_s20 }
 0x1f8   : > { %v607_v35 = vpop.permute.xlu1 %606  ;;  %v596_v36 = vpop.permute.xlu0 %595 }
 0x1f9   : > { %610 = vst.msk [vmem:[#allocation2 + $0x10] sm:$0xff] %vm591_vm3, %v607_v35  ;;  %599 = vst.msk [vmem:[#allocation2 + $0x8] sm:$0xff] %vm591_vm3, %v596_v36 }
 0x1fc   : > { %v612_v37 = vpop.permute.xlu1 %611  ;;  %v602_v38 = vpop.permute.xlu0 %601 }
 0x1fd   : > { %615 = vst.msk [vmem:[#allocation3 + $0x10] sm:$0xff] %vm591_vm3, %v612_v37  ;;  %605 = vst.msk [vmem:[#allocation3 + $0x8] sm:$0xff] %vm591_vm3, %v602_v38 }
 0x200   : > { %v622_v39 = vpop.permute.xlu1 %621  ;;  %v617_v40 = vpop.permute.xlu0 %616 }
 0x201   : > { %625 = vst.msk [vmem:[#allocation3 + $0x18] sm:$0xff] %vm591_vm3, %v622_v39  ;;  %620 = vst.msk [vmem:[#allocation2 + $0x18] sm:$0xff] %vm591_vm3, %v617_v40 }
 0x204   : > { %v2745_v41 = vpop.permute.xlu1 %718  ;;  %v2747_v42 = vpop.permute.xlu0 %716 }
 0x208   : > { %v2749_v43 = vpop.permute.xlu0 %720 }
 0x209 LB: >> { %v2371_v44 = vmov 0.0   ;;  %vm2372_vm4 = vmmov 0   ;;  %s2764_s24 = sshll.u32 %s2355_s19, 3  ;;  %v1054_v49 = vlaneseq  ;;  %v2373_v8 = vmov 0   ;;  %v1069_v9 = vld [vmem:[#allocation4] sm:$0xff]  ;;  %v2799_v12 = vld [vmem:[#allocation4 + $0x8] sm:$0xff]  ;;  %s2355_s19 = sphi %s2755_s19, %s740_s19  }
 0x20a   : >> { %1885 = vmatprep.subr.mxu0 %v2371_v44  ;;  %1887 = vmatprep.mubr.msk.f32.mxu0 %vm2372_vm4, %v2371_v44  ;;  %s744_s15 = scalar_lea.vmem [#allocation2], %s2764_s24  ;;  %v1060_v51 = vstv %s2764_s24  ;;  %v1071_v13 = vld [vmem:[#allocation4 + $0x10] sm:$0xff]  ;;  %v2803_v20 = vld [vmem:[#allocation4 + $0x18] sm:$0xff]  ;;  %s2812_s22 = scalar_lea.vmem [#allocation3], %s2764_s24 }
 0x20b   : >> { %1890 = vmatprep.subr.mxu1 %v2371_v44  ;;  %1892 = vmatprep.mubr.msk.f32.mxu1 %vm2372_vm4, %v2371_v44  ;;  %v745_v45 = vld [vmem:[%s744_s15] sm:$0xff]  ;;  %v746_v46 = vld [vmem:[%s744_s15 + $0x8] sm:$0xff]  ;;  %v747_v47 = vld [vmem:[%s744_s15 + $0x10] sm:$0xff]  ;;  %v1059_v50 = vand.u32 127, %v1054_v49  ;;  %v1055_v52 = vshrl.u32 %v1054_v49, 7  ;;  %s740_s19 = sadd.s32 1, %s2355_s19  }
 0x20c   : >> { %1886 = vmatpush3.xpose.msk.msra.mxu0 %vm591_vm3, %v745_v45  ;;  %1891 = vmatpush3.xpose.msk.msra.mxu1 %vm591_vm3, %v746_v46  ;;  %v748_v48 = vld [vmem:[%s744_s15 + $0x18] sm:$0xff]  ;;  %v750_v26 = vld [vmem:[%s2812_s22] sm:$0xff]  ;;  %v751_v28 = vld [vmem:[%s2812_s22 + $0x8] sm:$0xff]  ;;  %p739_p2 = scmp.ge.s32.totalorder %s740_s19, 1 }
 0x20d   : >> { %1895 = vmatprep.subr.mxu0 %v2371_v44  ;;  %1900 = vmatprep.subr.mxu1 %v2371_v44  ;;  %v1061_v53 = vadd.s32 %v1060_v51, %v1059_v50  ;;  %v752_v45 = vld [vmem:[%s2812_s22 + $0x10] sm:$0xff]  ;;  %v753_v49 = vld [vmem:[%s2812_s22 + $0x18] sm:$0xff]  ;;  %s2375_s16 = smov (%p739_p2), 8   ;;  %s2376_s17 = smov (%p739_p2), 16   ;;  %vm1542_vm6 = vcmask (%p739_p2), 130048   ;;  %vm1544_vm7 = vcmask (%p739_p2), 195584  }
 0x20e   : >> { %2087 = vset.pattern.permute.xlu0 %v2373_v8  ;;  %2088 = vset.pattern.permute.xlu1 %v2373_v8  ;;  %s2942_s12 = sld [smem:[#allocation21_spill]] (%p739_p2)  ;;  %s2377_s8 = smov (%p739_p2), 24  }
 0x20f   : >> { %1888 = vmatmul.mubr.msk.f32.vlgmr.msra.gmra.mrb[0].mxu0 %vm591_vm3, %v2734_v34  ;;  %1893 = vmatmul.mubr.msk.f32.vlgmr.msra.gmra.mrb[0].mxu1 %vm591_vm3, %v2747_v42  ;;  %vm1062_vm5 = vcmp.ge.s32.totalorder %v1055_v52, %v1061_v53  ;;  %v1547_v42 = vld [vmem:[#allocation15 + $0x8] sm:$0xff] (%p739_p2)  ;;  %s2943_s27 = sld [smem:[#allocation23_spill]] (%p739_p2)  ;;  %s1646_s20 = sshll.u32 (%p739_p2), %s2753_s25, 4  ;;  %s2859_s20 = int_to_ptr.vmem [resolvable:$true] %s1646_s20 }
 0x210   : >> { %1896 = vmatpush3.xpose.msk.msra.mxu0 %vm591_vm3, %v747_v47  ;;  %1897 = vmatprep.mubr.msk.f32.mxu0 %vm2372_vm4, %v2371_v44  ;;  %s2944_s15 = sld [smem:[#allocation24_spill]] (%p739_p2)  ;;  %p2945_p10 = scmp.ne.s32.totalorder (%p739_p2), %s2937_s28, 0 }
 0x211   : >> { %1901 = vmatpush3.xpose.msk.msra.mxu1 %vm591_vm3, %v748_v48  ;;  %1902 = vmatprep.mubr.msk.f32.mxu1 %vm2372_vm4, %v2371_v44 }
 0x212   : >> { %1905 = vmatprep.subr.mxu0 %v2371_v44  ;;  %1910 = vmatprep.subr.mxu1 %v2371_v44 }
 0x213   : >> { %1898 = vmatmul.mubr.msk.f32.vlgmr.msra.gmra.mrb[2].mxu0 %vm591_vm3, %v2745_v41  ;;  %v1546_v41 = vld [vmem:[#allocation15] sm:$0xff] (%p739_p2) }
 0x214   : >> { %1903 = vmatmul.mubr.msk.f32.vlgmr.msra.gmra.mrb[2].mxu1 %vm591_vm3, %v2749_v43  ;;  %1907 = vmatprep.mubr.msk.f32.mxu0 %vm2372_vm4, %v2371_v44  ;;  %v1955_v43 = vpack.c.bf16 (%p739_p2), %v1547_v42, %v1546_v41  ;;  %s1813_s23 = sshll.u32 (%p739_p2), %s2942_s12, 7  ;;  %s2378_s12 = smov (%p739_p2), [#allocation16]  }
 0x215   : >> { %1912 = vmatprep.mubr.msk.f32.mxu1 %vm2372_vm4, %v2371_v44  ;;  %1906 = vmatpush3.msra.mxu0 %v750_v26 }
 0x216   : >> { %1915 = vmatprep.subr.mxu0 %v2371_v44  ;;  %1911 = vmatpush3.msra.mxu1 %v751_v28  ;;  %s2857_s22 = scalar_lea.hbm (%p739_p2), %s2944_s15, %s1813_s23 }
 0x217   : >> { %1920 = vmatprep.subr.mxu1 %v2371_v44 }
 0x2e2   : >> { %v825_v54 = vpop.f32.mrb[0].mxu0  ;;  %v900_v55 = vpop.f32.mrb[0].mxu1 }
 0x2e3   : >> { %v1065_v56 = vsel %vm1062_vm5, %v825_v54, -1e+30  ;;  %v1889_v57 = vpop.f32.mrb[1].mxu0  ;;  %v1066_v58 = vsel %vm1062_vm5, %v900_v55, -1e+30  ;;  %v1894_v59 = vpop.f32.mrb[1].mxu1 }
 0x2e4   : >> { %v1073_v60 = vsel %vm591_vm3, %v1065_v56, -inf  ;;  %v1076_v61 = vsel %vm591_vm3, %v1066_v58, -inf }
 0x2e5   : >> { %1074 = vmax.xlane.f32.xlu0 %v1073_v60 }
 0x2e6   : >> { %v975_v62 = vpop.f32.mrb[2].mxu0 }
 0x2e7   : >> { %v1067_v63 = vsel %vm1062_vm5, %v975_v62, -1e+30  ;;  %v1899_v2 = vpop.f32.mrb[3].mxu0  ;;  %v1050_v3 = vpop.f32.mrb[2].mxu1  ;;  %v1133_v62 = vld [vmem:[#allocation5] sm:$0xff] }
 0x2e8   : >> { %v1068_v4 = vsel %vm1062_vm5, %v1050_v3, -1e+30  ;;  %v1079_v5 = vsel %vm591_vm3, %v1067_v63, -inf  ;;  %v1904_v6 = vpop.f32.mrb[3].mxu1  ;;  %v1134_v3 = vld [vmem:[#allocation5 + $0x8] sm:$0xff] }
 0x2e9   : >> { %1077 = vmax.xlane.f32.xlu0 %v1076_v61  ;;  %1080 = vmax.xlane.f32.xlu1 %v1079_v5  ;;  %v1082_v7 = vsel %vm591_vm3, %v1068_v4, -inf }
 0x2ed   : >> { %1083 = vmax.xlane.f32.xlu1 %v1082_v7 }
 0x372   : >> { %v1075_v10 = vpop.xlane.xlu0 %1074 }
 0x373   : >> { %v1085_v11 = vmax.f32 %v1069_v9, %v1075_v10 }
 0x375   : >> { %v1089_v14 = vsub.f32 %v1069_v9, %v1085_v11  ;;  %1489 = vst.msk [vmem:[#allocation4] sm:$0xff] %vm722_vm0, %v1085_v11  ;;  %1103 = vperm.xlu0 %2087, %v1085_v11   ;;  %v1135_v9 = vld [vmem:[#allocation5 + $0x10] sm:$0xff] }
 0x376   : >> { %v1078_v15 = vpop.xlane.xlu0 %1077  ;;  %v1081_v16 = vpop.xlane.xlu1 %1080 }
 0x377   : >> { %v1093_v17 = vmul.f32 1.442695, %v1089_v14  ;;  %v1086_v18 = vmax.f32 %v2799_v12, %v1078_v15  ;;  %v1087_v19 = vmax.f32 %v1071_v13, %v1081_v16 }
 0x379   : >> { %2089 = vpow2.f32 %v1093_v17  ;;  %v1090_v21 = vsub.f32 %v2799_v12, %v1086_v18  ;;  %1490 = vst.msk [vmem:[#allocation4 + $0x8] sm:$0xff] %vm722_vm0, %v1086_v18  ;;  %1108 = vperm.xlu1 %2088, %v1086_v18   ;;  %v1091_v22 = vsub.f32 %v1071_v13, %v1087_v19  ;;  %1491 = vst.msk [vmem:[#allocation4 + $0x10] sm:$0xff] %vm722_vm0, %v1087_v19  ;;  %v1136_v12 = vld [vmem:[#allocation5 + $0x18] sm:$0xff]  ;;  %v1161_v17 = vld [vmem:[#allocation6] sm:$0xff] }
 0x37a   : >> { %v1084_v23 = vpop.xlane.xlu1 %1083 }
 0x37b   : >> { %v1088_v24 = vmax.f32 %v2803_v20, %v1084_v23  ;;  %v1097_v51 = vmul.f32 1.442695, %v1091_v22  ;;  %v1095_v55 = vmul.f32 1.442695, %v1090_v21 }
 0x37d   : >> { %1113 = vperm.xlu1 %2088, %v1087_v19   ;;  %v1092_v25 = vsub.f32 %v2803_v20, %v1088_v24  ;;  %1492 = vst.msk [vmem:[#allocation4 + $0x18] sm:$0xff] %vm722_vm0, %v1088_v24  ;;  %v1162_v19 = vld [vmem:[#allocation6 + $0x8] sm:$0xff] }
 0x381   : >> { %1118 = vperm.xlu1 %2088, %v1088_v24  }
 0x383   : >> { %v2090_v27 = vpop.eup %2089 }
 0x385   : >> { %1167 = vperm.xlu1 %2088, %v2090_v27  }
 0x3f4   : >> { %v1104_v29 = vpop.permute.xlu0 %1103 }
 0x3f5   : >> { %v1121_v30 = vsub.f32 %v1065_v56, %v1104_v29 }
 0x3f7   : >> { %v1125_v31 = vmul.f32 1.442695, %v1121_v30  ;;  %v1164_v30 = vld [vmem:[#allocation6 + $0x18] sm:$0xff] }
 0x3f8   : >> { %v1109_v32 = vpop.permute.xlu1 %1108 }
 0x3f9   : >> { %2091 = vpow2.f32 %v1125_v31  ;;  %v1122_v33 = vsub.f32 %v1066_v58, %v1109_v32 }
 0x3fb   : >> { %v1127_v35 = vmul.f32 1.442695, %v1122_v33 }
 0x3fc   : >> { %v1114_v36 = vpop.permute.xlu1 %1113 }
 0x3fd   : >> { %2093 = vpow2.f32 %v1127_v35  ;;  %v1123_v37 = vsub.f32 %v1067_v63, %v1114_v36  ;;  %v1137_v63 = vmul.f32 %v2090_v27, %v1133_v62 }
 0x3ff   : >> { %v1129_v38 = vmul.f32 1.442695, %v1123_v37 }
 0x400   : >> { %v1119_v39 = vpop.permute.xlu1 %1118 }
 0x401   : >> { %2095 = vpow2.f32 %v1129_v38  ;;  %v1124_v40 = vsub.f32 %v1068_v4, %v1119_v39 }
 0x403   : >> { %v2092_v46 = vpop.eup %2091  ;;  %v1131_v47 = vmul.f32 1.442695, %v1124_v40 }
 0x404   : >> { %1908 = vmatmul.mubr.msk.f32.vlgmr.msra.gmra.mrb[4].mxu0 %vm591_vm3, %v2092_v46  ;;  %v1141_v48 = vsel %vm591_vm3, %v2092_v46, 0.0  ;;  %v1168_v61 = vpop.permute.xlu1 %1167 }
 0x405   : >> { %2097 = vpow2.f32 %v1131_v47  ;;  %1142 = vadd.xlane.f32.xlu1 %v1141_v48  ;;  %1916 = vmatpush3.msra.mxu0 %v752_v45  ;;  %v1185_v18 = vmul.f32 %v1168_v61, %v1161_v17  ;;  %v2374_v47 = vmov (%p739_p2), 0  }
 0x406   : >> { %1917 = vmatprep.mubr.msk.f32.mxu0 %vm2372_vm4, %v2371_v44  ;;  %2099 = vpow2.f32 %v1097_v51  ;;  %1954 = vmatprep.subr.bf16.mxu0 (%p739_p2), %v2364_v0 }
 0x407   : >> { %v2094_v50 = vpop.eup %2093  ;;  %2101 = vpow2.f32 %v1095_v55 }
 0x408   : >> { %1913 = vmatmul.mubr.msk.f32.vlgmr.msra.gmra.mrb[4].mxu1 %vm591_vm3, %v2094_v50  ;;  %v1144_v52 = vsel %vm591_vm3, %v2094_v50, 0.0 }
 0x409   : >> { %1145 = vadd.xlane.f32.xlu0 %v1144_v52  ;;  %1921 = vmatpush3.msra.mxu1 %v753_v49  ;;  %v1549_v52 = vld [vmem:[#allocation15 + $0x18] sm:$0xff] (%p739_p2) }
 0x40a   : >> { %1922 = vmatprep.mubr.msk.f32.mxu1 %vm2372_vm4, %v2371_v44  ;;  %v1099_v44 = vmul.f32 1.442695, %v1092_v25  ;;  %v1163_v25 = vld [vmem:[#allocation6 + $0x10] sm:$0xff] }
 0x40b   : >> { %v2096_v53 = vpop.eup %2095 }
 0x40c   : >> { %1918 = vmatmul.mubr.msk.f32.vlgmr.msra.gmra.mrb[6].mxu0 %vm591_vm3, %v2096_v53  ;;  %v1147_v58 = vsel %vm591_vm3, %v2096_v53, 0.0  ;;  %2103 = vpow2.f32 %v1099_v44 }
 0x40d   : > { %1933 = vmatprep.mubr.msk.f32.mxu0 (%p739_p2), %vm2365_vm1, %v2366_v1  ;;  %1956 = vmatpush3.bf16.msra.mxu0 (%p739_p2), %v1955_v43  ;;  %v1548_v1 = vld [vmem:[#allocation15 + $0x10] sm:$0xff] (%p739_p2) }
 0x40e   : > { %1957 = vmatprep.subr.bf16.mxu0 (%p739_p2), %v2364_v0  ;;  %v1958_v53 = vpack.c.bf16 (%p739_p2), %v1549_v52, %v1548_v1 }
 0x40f   : >> { %v2098_v54 = vpop.eup %2097 }
 0x410   : >> { %1923 = vmatmul.mubr.msk.f32.vlgmr.msra.gmra.mrb[6].mxu1 %vm591_vm3, %v2098_v54  ;;  %v2100_v56 = vpop.eup %2099  ;;  %v1150_v59 = vsel %vm591_vm3, %v2098_v54, 0.0 }
 0x411   : >> { %v2102_v57 = vpop.eup %2101  ;;  %v1139_v10 = vmul.f32 %v2100_v56, %v1135_v9  ;;  %1959 = vmatpush3.bf16.msra.mxu0 (%p739_p2), %v1958_v53 }
 0x412   : >> { %v1138_v5 = vmul.f32 %v2102_v57, %v1134_v3 }
 0x416   : >> { %1177 = vperm.xlu1 %2088, %v2100_v56   ;;  %v2104_v60 = vpop.eup %2103 }
 0x417   : >> { %v1140_v14 = vmul.f32 %v2104_v60, %v1136_v12 }
 0x41f   : >> { %1172 = vperm.xlu0 %2087, %v2102_v57  }
 0x423   : > { %2105 = vset.pattern.permute.xlu0 (%p739_p2), %v2374_v47 }
 0x43a   : >> { %1148 = vadd.xlane.f32.xlu1 %v1147_v58 }
 0x43e   : >> { %1151 = vadd.xlane.f32.xlu1 %v1150_v59 }
 0x44f   : >> { %1182 = vperm.xlu1 %2088, %v2104_v60  }
 0x453   : > { %2106 = vset.pattern.permute.xlu1 (%p739_p2), %v2374_v47 }
 0x492   : >> { %v1143_v2 = vpop.xlane.xlu1 %1142 }
 0x493   : >> { %v1153_v4 = vadd.f32 %v1143_v2, %v1137_v63 }
 0x495   : >> { %1157 = vst.msk [vmem:[#allocation5] sm:$0xff] %vm722_vm0, %v1153_v4 }
 0x496   : >> { %v1146_v6 = vpop.xlane.xlu0 %1145  ;;  %v1178_v8 = vpop.permute.xlu1 %1177 }
 0x497   : >> { %v1154_v7 = vadd.f32 %v1146_v6, %v1138_v5  ;;  %v1187_v29 = vmul.f32 %v1178_v8, %v1163_v25  ;;  %v1810_v8 = vld [vmem:[%s2943_s27] ss:$0 sm:$0xff] (%p739_p2) }
 0x499   : >> { %1158 = vst.msk [vmem:[#allocation5 + $0x8] sm:$0xff] %vm722_vm0, %v1154_v7 }
 0x49c   : > { %v1497_v48 = vld [vmem:[#allocation5] sm:$0xff] (%p739_p2) }
 0x49e   : >> { %v1173_v20 = vpop.permute.xlu0 %1172 }
 0x49f   : >> { %v1186_v24 = vmul.f32 %v1173_v20, %v1162_v19 }
 0x4a0   : > { %v1498_v40 = vld [vmem:[#allocation5 + $0x8] sm:$0xff] (%p739_p2) }
 0x4a1   : > { %2107 = vrcp.f32 (%p739_p2), %v1498_v40 }
 0x4ab   : > { %v2108_v49 = vpop.eup (%p739_p2), %2107 }
 0x4ac   : > { %1512 = vperm.xlu0 (%p739_p2), %2105, %v2108_v49  }
 0x4c7   : >> { %v1149_v11 = vpop.xlane.xlu1 %1148 }
 0x4c8   : >> { %v1155_v13 = vadd.f32 %v1149_v11, %v1139_v10 }
 0x4ca   : >> { %1159 = vst.msk [vmem:[#allocation5 + $0x10] sm:$0xff] %vm722_vm0, %v1155_v13 }
 0x4cb   : >> { %v1152_v15 = vpop.xlane.xlu1 %1151 }
 0x4cc   : >> { %v1156_v16 = vadd.f32 %v1152_v15, %v1140_v14 }
 0x4ce   : >> { %1160 = vst.msk [vmem:[#allocation5 + $0x18] sm:$0xff] %vm722_vm0, %v1156_v16 }
 0x4cf   : >> { %v1183_v31 = vpop.permute.xlu1 %1182 }
 0x4d0   : >> { %v1188_v36 = vmul.f32 %v1183_v31, %v1164_v30 }
 0x4d1   : > { %v1499_v46 = vld [vmem:[#allocation5 + $0x10] sm:$0xff] (%p739_p2) }
 0x4d5   : > { %v1500_v45 = vld [vmem:[#allocation5 + $0x18] sm:$0xff] (%p739_p2) }
 0x4d6   : > { %2109 = vrcp.f32 (%p739_p2), %v1500_v45 }
 0x4d7   : >> { %v1258_v21 = vpop.f32.mrb[4].mxu0  ;;  %2111 = vrcp.f32 (%p739_p2), %v1499_v46 }
 0x4d8   : >> { %v1481_v22 = vadd.f32 %v1258_v21, %v1185_v18  ;;  %v1909_v23 = vpop.f32.mrb[5].mxu0  ;;  %2113 = vrcp.f32 (%p739_p2), %v1497_v48 }
 0x4da   : >> { %1485 = vst.msk [vmem:[#allocation6] sm:$0xff] %vm591_vm3, %v1481_v22 }
 0x4db   : >> { %v1331_v26 = vpop.f32.mrb[4].mxu1 }
 0x4dc   : >> { %v1482_v27 = vadd.f32 %v1331_v26, %v1186_v24  ;;  %v1914_v28 = vpop.f32.mrb[5].mxu1 }
 0x4de   : >> { %1486 = vst.msk [vmem:[#allocation6 + $0x8] sm:$0xff] %vm591_vm3, %v1482_v27 }
 0x4df   : >> { %v1404_v32 = vpop.f32.mrb[6].mxu0 }
 0x4e0   : >> { %v1483_v33 = vadd.f32 %v1404_v32, %v1187_v29  ;;  %v1919_v35 = vpop.f32.mrb[7].mxu0  ;;  %742 = sbr.rel (!%p739_p2) target bundleno = 521 (0x209), region = 137  ;;  %v2110_v50 = vpop.eup (%p739_p2), %2109 }
 0x4e1   : > { %v2112_v51 = vpop.eup (%p739_p2), %2111  ;;  %1522 = vperm.xlu1 (%p739_p2), %2106, %v2110_v50   ;;  %v1493_v62 = vld [vmem:[#allocation6] sm:$0xff] (%p739_p2) }
 0x4e2   : >> { %1487 = vst.msk [vmem:[#allocation6 + $0x10] sm:$0xff] %vm591_vm3, %v1483_v33  ;;  %v2114_v34 = vpop.eup (%p739_p2), %2113  ;;  %1517 = vperm.xlu0 (%p739_p2), %2105, %v2112_v51  }
 0x4e3   : >> { %v1477_v37 = vpop.f32.mrb[6].mxu1 }
 0x4e4   : >> { %v1484_v38 = vadd.f32 %v1477_v37, %v1188_v36  ;;  %v1924_v39 = vpop.f32.mrb[7].mxu1 }
 0x4e5   : > { %1507 = vperm.xlu1 (%p739_p2), %2106, %v2114_v34   ;;  %v1494_v54 = vld [vmem:[#allocation6 + $0x8] sm:$0xff] (%p739_p2) }
 0x4e6   : >> { %1488 = vst.msk [vmem:[#allocation6 + $0x18] sm:$0xff] %vm591_vm3, %v1484_v38 }
 0x4e9   : > { %v1495_v59 = vld [vmem:[#allocation6 + $0x10] sm:$0xff] }
 0x4ed   : > { %v1496_v56 = vld [vmem:[#allocation6 + $0x18] sm:$0xff] }
 0x52b   : > { %v1513_v55 = vpop.permute.xlu0 %1512 }
 0x52c   : > { %v1526_v57 = vmul.f32 %v1513_v55, %v1494_v54 }
 0x52e   : > { %1530 = vrot.lane.b32.xlu0 %v1526_v57, %s2375_s16  ;;  %s1632_s16 = scalar_lea.sflag [#allocation9], %s2667_s1 }
 0x560   : > { %v1523_v58 = vpop.permute.xlu1 %1522 }
 0x561   : > { %v1528_v44 = vmul.f32 %v1523_v58, %v1496_v56  ;;  %v1518_v60 = vpop.permute.xlu0 %1517 }
 0x562   : > { %v1527_v61 = vmul.f32 %v1518_v60, %v1495_v59 }
 0x563   : > { %1538 = vrot.lane.b32.xlu0 %v1528_v44, %s2377_s8  ;;  %s2261_s8 = sshll.u32 %s2378_s12, 4  ;;  %s2262_s8 = int_to_ptr.vmem [resolvable:$false] %s2261_s8 }
 0x564   : > { %1534 = vrot.lane.b32.xlu1 %v1527_v61, %s2376_s17  ;;  %v1508_v0 = vpop.permute.xlu1 %1507  ;;  %s2257_s17 = scalar_lea.vmem %s2859_s20, 128  ;;  %s2263_s9 = scalar_lea.vmem %s2262_s8, 256 }
 0x565   : > { %v1525_v2 = vmul.f32 %v1508_v0, %v1493_v62  ;;  %p2258_p9 = scmp.ne.s32.totalorder %s2859_s20, %s2257_s17  ;;  %p2264_p7 = scmp.lt.s32.totalorder %s2859_s20, %s2262_s8 }
 0x566   : > { %p2265_p5 = scmp.lt.s32.totalorder %s2263_s9, %s2257_s17 }
 0x567   : > { %p2259_p1 = pnand %p2258_p9, %p2945_p10 }
 0x568   : > { %p2266_p8 = por %p2265_p5, %p2264_p7 }
 0x569   : > { %p2260_p0 = pneg %p2259_p1 }
 0x56b   : > { %p2267_p3 = pnand %p2266_p8, %p2260_p0 }
 0x5a0   : > { %v1531_v63 = vpop.permute.xlu0 %1530 }
 0x5a1   : > { %v1541_v3 = vsel %vm591_vm3, %v1525_v2, %v1531_v63 }
 0x5d5   : > { %v1539_v5 = vpop.permute.xlu0 %1538 }
 0x5d6   : > { %v1535_v4 = vpop.permute.xlu1 %1534 }
 0x5d7   : > { %v1543_v6 = vsel %vm1542_vm6, %v1541_v3, %v1535_v4 }
 0x5d8   : > { %v1545_v7 = vsel %vm1544_vm7, %v1543_v6, %v1539_v5 }
 0x5d9   : > { %1934 = vmatmul.mubr.msk.f32.vlgmr.msra.gmra.mrb[0].mxu0 %vm436_vm2, %v1545_v7 }
 0x6ac   : > { %v1626_v9 = vpop.f32.mrb[0].mxu0 }
 0x6ad   : > { %v1627_v10 = vadd.f32 %v1810_v8, %v1626_v9  ;;  %v1935_v11 = vpop.f32.mrb[1].mxu0 }
 0x6af   : > { %1630 = vst.msk [vmem:[%s2753_s25] sm:$0xff] %vm436_vm2, %v1627_v10 }
 0x6b0   : > { %2270 = shalt.err (!%p2267_p3)
}
 0x6b1   : > { %s2271_s1 = scalar_lea.hbm %s2857_s22, 128  ;;  %s2275_s27 = scalar_lea.hbm %s2944_s15, 256 }
 0x6b2   : > { %p2272_p11 = scmp.ne.s32.totalorder %s2857_s22, %s2271_s1  ;;  %p2276_p12 = scmp.lt.u32.totalorder %s2857_s22, %s2944_s15 }
 0x6b3   : > { %p2277_p4 = scmp.lt.u32.totalorder %s2275_s27, %s2271_s1  ;;  %p2279_p9 = scmp.lt.u32.totalorder %s2271_s1, %s2857_s22 }
 0x6b4   : > { %p2273_p6 = pnand %p2272_p11, %p2945_p10 }
 0x6b5   : > { %p2278_p2 = por %p2277_p4, %p2276_p12 }
 0x6b6   : > { %p2274_p13 = pneg %p2273_p6 }
 0x6b7   : > { %p2280_p1 = por %p2279_p9, %p2278_p2 }
 0x6b9   : > { %p2281_p0 = pnand %p2280_p1, %p2274_p13 }
 0x6bb   : > { %2284 = shalt.err (!%p2281_p0)
}
 0x6bc   : > { %1978 = dma.vmem_to_hbm [thread:$0]  (%p2945_p10), %s2859_s20, 128, %s2857_s22, %s1632_s16  }
 0x6bd PF: > { %s1658_s24 = sand.u32 1, %s2331_s30   ;;  %p2946_p7 = scmp.ne.s32.totalorder %s2938_s21, 0 }
 0x6be   : > { %p2947_p5 = scmp.ge.s32.totalorder %s2351_s14, 2  ;;  %s1659_s17 = scalar_lea.sflag [#allocation9], %s1658_s24 }
 0x6c0   : > { %p1998_p8 = pnand %p2947_p5, %p2946_p7 }
 0x6c2   : > { %2326 = dma.done.wait (!%p1998_p8), %s1659_s17, 128  }
 0x6c3   : > { %2328 = vsyncadd (!%p1998_p8), %s1659_s17, 4294967168  ;;  %s27_s14 = sadd.s32 1, %s2351_s14   ;;  %s2948_s30 = smov %s2335_s10 }
 0x6c4   : > { %p24_p3 = scmp.ge.s32.totalorder %s27_s14, 4   ;;  %s2949_s10 = smov %s2339_s11 }
 0x6c5   : > { %s2950_s11 = smov %s2617_s29  ;;  %s2951_s12 = smov %s2347_s13 }
 0x6c6   : > { %s2952_s13 = smov %s2954_s18  ;;  %26 = sbr.rel (!%p24_p3) target bundleno = 12 (0xc), region = 148 }
 0x6cd   :  { %1664 = vsyncpa [#allocation8], 1 }
 0x6ce   :  { %1666 = vsyncpa [#allocation8 + $0x1], 1 }
 0x6cf   :  { %1667 = vsyncpa [#allocation11], 1 }
 0x6d0   :  { %1668 = vsyncpa [#allocation14], 1 }
 0x6d1   :  { %1669 = vsyncpa [#allocation9], 1 }
 0x6d2   :  { %1671 = vsyncpa [#allocation9 + $0x1], 1 }

</bundles_post_ra>
